<compile_context>
chip_gen: v5e
topology: v5e:2x2
jax: 0.10.0
libtpu: 0.0.40
codegen_flags: <defaults>
</compile_context>

<pallas_src>
import math

import numpy as np

import jax
import jax.numpy as jnp
from jax.experimental import pallas as pl
from jax.experimental.pallas import tpu as pltpu

DILATIONS = (5, 7, 9, 11)
EPS = 1e-5


def _cdcm_kernel(x_ref, w1e_ref, b1_ref, s_ref, mbig_ref, pool_ref, g_ref,
                 beta_ref, o_ref):
    """One image per grid step; all work in the lane-dense (H, W*Cout) layout."""
    mm_dtype = w1e_ref.dtype
    n_shift = s_ref.shape[0]

    # ---- conv1: 1x1 conv as a block-diagonal channel matmul (+ bias) -----------
    x = x_ref[0]                                                    # (H, W*Cin)
    y = jnp.dot(x.astype(mm_dtype), w1e_ref[...],
                preferred_element_type=jnp.float32) + b1_ref[...]   # (H, W*Cout) f32

    # ---- 4 dilated 3x3 convs fused into ONE K = n_shift*W*Cout contraction -----
    # Vertical taps via tiny shift-matrix matmuls (MXU; no sublane retiling);
    # horizontal taps + channel mixing + border zeroing are baked into mbig_ref.
    y_mm = y.astype(mm_dtype)
    taps = [
        jnp.dot(s_ref[s], y_mm,
                preferred_element_type=jnp.float32).astype(mm_dtype)
        for s in range(n_shift)
    ]
    y_cat = jnp.concatenate(taps, axis=-1)                   # (H, n_shift*W*Cout)
    acc = jnp.dot(y_cat, mbig_ref[...],
                  preferred_element_type=jnp.float32)        # (H, W*Cout) f32

    # ---- LayerNorm over channels (population variance), lane-dense -------------
    # pool_ref = kron(I_W, ones(C,C)/C): per-(h,w) channel mean, broadcast back.
    mean = jnp.dot(acc, pool_ref[...], preferred_element_type=jnp.float32)
    centered = acc - mean
    var = jnp.dot(centered * centered, pool_ref[...],
                  preferred_element_type=jnp.float32)
    denom = jnp.sqrt(var) + EPS
    inv = pl.reciprocal(denom, approx=True)                  # EUP slot
    inv = inv * (2.0 - denom * inv)                          # one Newton step -> f32 accuracy
    z = centered * inv * g_ref[...] + beta_ref[...]

    # ---- exact (erf) GELU, matching torch.nn.GELU() default --------------------
    out = 0.5 * z * (1.0 + jax.lax.erf(z * (1.0 / math.sqrt(2.0))))
    o_ref[...] = out.reshape(o_ref.shape).astype(o_ref.dtype)


def _pack_weights(w1, b1, wd, g, beta, H, W, matmul_dtype):
    """Host-side repacking of CDCM parameters into lane-dense fused operands."""
    Cin, Cout = w1.shape
    WC = W * Cout

    # conv1 as block-diagonal (W*Cin, W*Cout); bias/gamma/beta tiled to (1, W*Cout).
    w1e = jnp.kron(jnp.eye(W, dtype=jnp.float32), w1.astype(jnp.float32))
    b1_f = jnp.tile(b1.astype(jnp.float32), W)[None, :]
    g_f = jnp.tile(g.astype(jnp.float32), W)[None, :]
    beta_f = jnp.tile(beta.astype(jnp.float32), W)[None, :]

    # 9 distinct vertical offsets: 0 and +-d for each dilation.
    shifts = [0] + [s * d for d in DILATIONS for s in (-1, 1)]
    hh = np.arange(H)
    s_all = np.stack(
        [(hh[None, :] == hh[:, None] + v).astype(np.float32) for v in shifts])

    # Block-sparse fused dilated weight: rows indexed by (shift, w_src, ci),
    # columns by (w_dst, co). Horizontal zero-padding == absent blocks.
    wd_np = np.asarray(wd, np.float32)            # (n_dil, 3, 3, Cout, Cout)
    m_big = np.zeros((len(shifts) * WC, WC), np.float32)
    for s_idx, v in enumerate(shifts):
        for di, d in enumerate(DILATIONS):
            for i in range(3):
                if (i - 1) * d != v:
                    continue
                for j in range(3):
                    dx = (j - 1) * d
                    for w_dst in range(W):
                        w_src = w_dst + dx
                        if 0 <= w_src < W:
                            r0 = s_idx * WC + w_src * Cout
                            c0 = w_dst * Cout
                            m_big[r0:r0 + Cout, c0:c0 + Cout] += wd_np[di, i, j]

    # Per-(h,w) channel-mean pooling matrix (block-diagonal ones/Cout).
    pool = jnp.kron(jnp.eye(W, dtype=jnp.float32),
                    jnp.full((Cout, Cout), 1.0 / Cout, jnp.float32))

    return (w1e.astype(matmul_dtype), b1_f,
            jnp.asarray(s_all, matmul_dtype), jnp.asarray(m_big, matmul_dtype),
            pool, g_f, beta_f)


def cdcm_forward(x, w1, b1, wd, g, beta, *, matmul_dtype=jnp.float32):
    """CDCM forward. x is NHWC; returns NHWC float32.

    matmul_dtype=jnp.bfloat16 runs the MXU contractions with bf16 operands and
    f32 accumulation (recommended on v6e/v7x); LayerNorm/GELU always stay f32.
    """
    N, H, W, Cin = x.shape
    Cout = w1.shape[1]
    WC = W * Cout

    w1e, b1_f, s_all, m_big, pool, g_f, beta_f = _pack_weights(
        w1, b1, wd, g, beta, H, W, matmul_dtype)
    n_shift = s_all.shape[0]

    x_f = x.reshape(N, H, W * Cin)   # lane-fused input (free, contiguous reshape)

    def _nbytes(a):
        return int(a.size) * a.dtype.itemsize

    n_taps = len(DILATIONS) * 9
    cost = pl.CostEstimate(
        flops=int(2 * N * H * W * Cout * (Cin + n_taps * Cout)),
        transcendentals=int(N * H * W * Cout),
        bytes_accessed=int(
            _nbytes(x_f) + N * H * WC * 4
            + sum(_nbytes(a) for a in (w1e, b1_f, s_all, m_big, pool, g_f, beta_f))),
    )

    # TODO(synk): for large feature maps (esp. v7x's 64 MiB VMEM) add a row-strip
    # grid axis with a +-max(DILATIONS) halo instead of one whole image per step.
    out_f = pl.pallas_call(
        _cdcm_kernel,
        out_shape=jax.ShapeDtypeStruct((N, H, WC), jnp.float32),
        grid_spec=pltpu.PrefetchScalarGridSpec(
            num_scalar_prefetch=0,
            grid=(N,),
            in_specs=[
                pl.BlockSpec((1, H, W * Cin), lambda n: (n, 0, 0)),
                pl.BlockSpec((W * Cin, WC), lambda n: (0, 0)),
                pl.BlockSpec((1, WC), lambda n: (0, 0)),
                pl.BlockSpec((n_shift, H, H), lambda n: (0, 0, 0)),
                pl.BlockSpec((n_shift * WC, WC), lambda n: (0, 0)),
                pl.BlockSpec((WC, WC), lambda n: (0, 0)),
                pl.BlockSpec((1, WC), lambda n: (0, 0)),
                pl.BlockSpec((1, WC), lambda n: (0, 0)),
            ],
            out_specs=pl.BlockSpec((1, H, WC), lambda n: (n, 0, 0)),
        ),
        compiler_params=pltpu.CompilerParams(
            dimension_semantics=("parallel",)),
        cost_estimate=cost,
    )(x_f, w1e, b1_f, s_all, m_big, pool, g_f, beta_f)

    return out_f.reshape(N, H, W, Cout)


def cdcm_reference(x, w1, b1, wd, g, beta):
    """Pure-JAX (NHWC) reference matching the PyTorch CDCM forward."""
    Cout = w1.shape[1]
    y = jnp.einsum('nhwc,cd->nhwd', x, w1) + b1.reshape(1, 1, 1, Cout)
    acc = jnp.zeros(y.shape, jnp.float32)
    for di, d in enumerate(DILATIONS):
        acc = acc + jax.lax.conv_general_dilated(
            y, wd[di], window_strides=(1, 1), padding=((d, d), (d, d)),
            rhs_dilation=(d, d), dimension_numbers=('NHWC', 'HWIO', 'NHWC'))
    mean = jnp.mean(acc, axis=-1, keepdims=True)
    var = jnp.mean((acc - mean) ** 2, axis=-1, keepdims=True)
    z = ((acc - mean) / (jnp.sqrt(var) + EPS) * g.reshape(1, 1, 1, Cout)
         + beta.reshape(1, 1, 1, Cout))
    return 0.5 * z * (1.0 + jax.lax.erf(z * (1.0 / math.sqrt(2.0))))


if __name__ == "__main__":
    N, Cin, Cout, H, W = 2, 4, 8, 16, 16

    key = jax.random.PRNGKey(0)
    k_x, k_w1, k_b1, k_wd, k_g, k_b = jax.random.split(key, 6)

    # Synthetic parameters with the shapes CDCM.__init__ implies:
    #   conv1:   w1 (Cin, Cout), bias b1 (Cout,)
    #   conv2_*: wd (4 dilations, 3, 3, Cout, Cout)  [HWIO per dilation, no bias]
    #   norm2:   g, beta (Cout,)
    x = jax.random.normal(k_x, (N, H, W, Cin), jnp.float32)
    w1 = jax.random.normal(k_w1, (Cin, Cout), jnp.float32) * 0.2
    b1 = jax.random.normal(k_b1, (Cout,), jnp.float32) * 0.1
    wd = jax.random.normal(k_wd, (len(DILATIONS), 3, 3, Cout, Cout), jnp.float32) * 0.1
    g = 1.0 + 0.1 * jax.random.normal(k_g, (Cout,), jnp.float32)
    beta = 0.1 * jax.random.normal(k_b, (Cout,), jnp.float32)

    ref = jax.block_until_ready(cdcm_reference(x, w1, b1, wd, g, beta))

    # f32 MXU path (all generations).
    out = jax.block_until_ready(cdcm_forward(x, w1, b1, wd, g, beta))
    assert out.shape == (N, H, W, Cout), out.shape
    max_err = float(jnp.max(jnp.abs(out - ref)))
    assert max_err < 1e-3, f"f32 kernel mismatch vs reference, max_err={max_err}"

    # bf16-operand MXU path (fast path on v6e/v7x); f32 accumulation, but the
    # 288-term contraction + per-8-channel normalization amplify bf16 rounding,
    # so only a loose sanity bound is asserted here.
    out_bf16 = jax.block_until_ready(
        cdcm_forward(x, w1, b1, wd, g, beta, matmul_dtype=jnp.bfloat16))
    max_err_bf16 = float(jnp.max(jnp.abs(out_bf16 - ref)))
    assert max_err_bf16 < 0.1, f"bf16 kernel mismatch vs reference, max_err={max_err_bf16}"

    print("KERNEL_OK")
</pallas_src>

<mosaic_0001>
module attributes {stable_mosaic.version = 11 : i64} {
  func.func @_cdcm_kernel(%arg0: i32, %arg1: memref<1x16x64xf32, #tpu.memory_space<vmem>>, %arg2: memref<64x128xf32, #tpu.memory_space<vmem>>, %arg3: memref<1x128xf32, #tpu.memory_space<vmem>>, %arg4: memref<9x16x16xf32, #tpu.memory_space<vmem>>, %arg5: memref<1152x128xf32, #tpu.memory_space<vmem>>, %arg6: memref<128x128xf32, #tpu.memory_space<vmem>>, %arg7: memref<1x128xf32, #tpu.memory_space<vmem>>, %arg8: memref<1x128xf32, #tpu.memory_space<vmem>>, %arg9: memref<1x16x128xf32, #tpu.memory_space<vmem>>) attributes {dimension_semantics = [#tpu.dimension_semantics<parallel>], iteration_bounds = array<i64: 2>, scalar_prefetch = 0 : i64, scratch_operands = 0 : i64, tpu.core_type = #tpu.core_type<tc>, window_params = [{transform_indices = @transform_0, window_bounds = array<i64: 1, 16, 64>}, {pipeline_mode = #tpu.pipeline_mode<synchronous>, transform_indices = @transform_1, window_bounds = array<i64: 64, 128>}, {pipeline_mode = #tpu.pipeline_mode<synchronous>, transform_indices = @transform_2, window_bounds = array<i64: 1, 128>}, {pipeline_mode = #tpu.pipeline_mode<synchronous>, transform_indices = @transform_3, window_bounds = array<i64: 9, 16, 16>}, {pipeline_mode = #tpu.pipeline_mode<synchronous>, transform_indices = @transform_4, window_bounds = array<i64: 1152, 128>}, {pipeline_mode = #tpu.pipeline_mode<synchronous>, transform_indices = @transform_5, window_bounds = array<i64: 128, 128>}, {pipeline_mode = #tpu.pipeline_mode<synchronous>, transform_indices = @transform_6, window_bounds = array<i64: 1, 128>}, {pipeline_mode = #tpu.pipeline_mode<synchronous>, transform_indices = @transform_7, window_bounds = array<i64: 1, 128>}, {transform_indices = @transform_8, window_bounds = array<i64: 1, 16, 128>}]} {
    %c0 = arith.constant 0 : index
    %c0_0 = arith.constant 0 : index
    %c0_1 = arith.constant 0 : index
    %0 = vector.load %arg1[%c0, %c0_0, %c0_1] : memref<1x16x64xf32, #tpu.memory_space<vmem>>, vector<1x16x64xf32>
    %1 = vector.shape_cast %0 : vector<1x16x64xf32> to vector<16x64xf32>
    %c0_2 = arith.constant 0 : index
    %c0_3 = arith.constant 0 : index
    %2 = vector.load %arg2[%c0_2, %c0_3] : memref<64x128xf32, #tpu.memory_space<vmem>>, vector<64x128xf32>
    %cst = arith.constant dense<0.000000e+00> : vector<16x128xf32>
    %3 = tpu.matmul %1, %2, %cst {dimension_numbers = #tpu.dot_dimension_numbers<[1], [0], [0], [1], [0, 0, 1, 1], [], []>} : vector<16x64xf32>, vector<64x128xf32>, vector<16x128xf32> -> vector<16x128xf32>
    %c0_4 = arith.constant 0 : index
    %c0_5 = arith.constant 0 : index
    %4 = vector.load %arg3[%c0_4, %c0_5] : memref<1x128xf32, #tpu.memory_space<vmem>>, vector<1x128xf32>
    %5 = vector.broadcast %4 : vector<1x128xf32> to vector<16x128xf32>
    %6 = arith.addf %3, %5 : vector<16x128xf32>
    %c0_6 = arith.constant 0 : index
    %c0_7 = arith.constant 0 : index
    %c0_8 = arith.constant 0 : index
    %7 = vector.load %arg4[%c0_6, %c0_7, %c0_8] : memref<9x16x16xf32, #tpu.memory_space<vmem>>, vector<1x16x16xf32>
    %8 = vector.shape_cast %7 : vector<1x16x16xf32> to vector<16x16xf32>
    %cst_9 = arith.constant dense<0.000000e+00> : vector<16x128xf32>
    %9 = tpu.matmul %8, %6, %cst_9 {dimension_numbers = #tpu.dot_dimension_numbers<[1], [0], [0], [1], [0, 0, 1, 1], [], []>} : vector<16x16xf32>, vector<16x128xf32>, vector<16x128xf32> -> vector<16x128xf32>
    %c1 = arith.constant 1 : index
    %c0_10 = arith.constant 0 : index
    %c0_11 = arith.constant 0 : index
    %10 = vector.load %arg4[%c1, %c0_10, %c0_11] : memref<9x16x16xf32, #tpu.memory_space<vmem>>, vector<1x16x16xf32>
    %11 = vector.shape_cast %10 : vector<1x16x16xf32> to vector<16x16xf32>
    %cst_12 = arith.constant dense<0.000000e+00> : vector<16x128xf32>
    %12 = tpu.matmul %11, %6, %cst_12 {dimension_numbers = #tpu.dot_dimension_numbers<[1], [0], [0], [1], [0, 0, 1, 1], [], []>} : vector<16x16xf32>, vector<16x128xf32>, vector<16x128xf32> -> vector<16x128xf32>
    %c2 = arith.constant 2 : index
    %c0_13 = arith.constant 0 : index
    %c0_14 = arith.constant 0 : index
    %13 = vector.load %arg4[%c2, %c0_13, %c0_14] : memref<9x16x16xf32, #tpu.memory_space<vmem>>, vector<1x16x16xf32>
    %14 = vector.shape_cast %13 : vector<1x16x16xf32> to vector<16x16xf32>
    %cst_15 = arith.constant dense<0.000000e+00> : vector<16x128xf32>
    %15 = tpu.matmul %14, %6, %cst_15 {dimension_numbers = #tpu.dot_dimension_numbers<[1], [0], [0], [1], [0, 0, 1, 1], [], []>} : vector<16x16xf32>, vector<16x128xf32>, vector<16x128xf32> -> vector<16x128xf32>
    %c3 = arith.constant 3 : index
    %c0_16 = arith.constant 0 : index
    %c0_17 = arith.constant 0 : index
    %16 = vector.load %arg4[%c3, %c0_16, %c0_17] : memref<9x16x16xf32, #tpu.memory_space<vmem>>, vector<1x16x16xf32>
    %17 = vector.shape_cast %16 : vector<1x16x16xf32> to vector<16x16xf32>
    %cst_18 = arith.constant dense<0.000000e+00> : vector<16x128xf32>
    %18 = tpu.matmul %17, %6, %cst_18 {dimension_numbers = #tpu.dot_dimension_numbers<[1], [0], [0], [1], [0, 0, 1, 1], [], []>} : vector<16x16xf32>, vector<16x128xf32>, vector<16x128xf32> -> vector<16x128xf32>
    %c4 = arith.constant 4 : index
    %c0_19 = arith.constant 0 : index
    %c0_20 = arith.constant 0 : index
    %19 = vector.load %arg4[%c4, %c0_19, %c0_20] : memref<9x16x16xf32, #tpu.memory_space<vmem>>, vector<1x16x16xf32>
    %20 = vector.shape_cast %19 : vector<1x16x16xf32> to vector<16x16xf32>
    %cst_21 = arith.constant dense<0.000000e+00> : vector<16x128xf32>
    %21 = tpu.matmul %20, %6, %cst_21 {dimension_numbers = #tpu.dot_dimension_numbers<[1], [0], [0], [1], [0, 0, 1, 1], [], []>} : vector<16x16xf32>, vector<16x128xf32>, vector<16x128xf32> -> vector<16x128xf32>
    %c5 = arith.constant 5 : index
    %c0_22 = arith.constant 0 : index
    %c0_23 = arith.constant 0 : index
    %22 = vector.load %arg4[%c5, %c0_22, %c0_23] : memref<9x16x16xf32, #tpu.memory_space<vmem>>, vector<1x16x16xf32>
    %23 = vector.shape_cast %22 : vector<1x16x16xf32> to vector<16x16xf32>
    %cst_24 = arith.constant dense<0.000000e+00> : vector<16x128xf32>
    %24 = tpu.matmul %23, %6, %cst_24 {dimension_numbers = #tpu.dot_dimension_numbers<[1], [0], [0], [1], [0, 0, 1, 1], [], []>} : vector<16x16xf32>, vector<16x128xf32>, vector<16x128xf32> -> vector<16x128xf32>
    %c6 = arith.constant 6 : index
    %c0_25 = arith.constant 0 : index
    %c0_26 = arith.constant 0 : index
    %25 = vector.load %arg4[%c6, %c0_25, %c0_26] : memref<9x16x16xf32, #tpu.memory_space<vmem>>, vector<1x16x16xf32>
    %26 = vector.shape_cast %25 : vector<1x16x16xf32> to vector<16x16xf32>
    %cst_27 = arith.constant dense<0.000000e+00> : vector<16x128xf32>
    %27 = tpu.matmul %26, %6, %cst_27 {dimension_numbers = #tpu.dot_dimension_numbers<[1], [0], [0], [1], [0, 0, 1, 1], [], []>} : vector<16x16xf32>, vector<16x128xf32>, vector<16x128xf32> -> vector<16x128xf32>
    %c7 = arith.constant 7 : index
    %c0_28 = arith.constant 0 : index
    %c0_29 = arith.constant 0 : index
    %28 = vector.load %arg4[%c7, %c0_28, %c0_29] : memref<9x16x16xf32, #tpu.memory_space<vmem>>, vector<1x16x16xf32>
    %29 = vector.shape_cast %28 : vector<1x16x16xf32> to vector<16x16xf32>
    %cst_30 = arith.constant dense<0.000000e+00> : vector<16x128xf32>
    %30 = tpu.matmul %29, %6, %cst_30 {dimension_numbers = #tpu.dot_dimension_numbers<[1], [0], [0], [1], [0, 0, 1, 1], [], []>} : vector<16x16xf32>, vector<16x128xf32>, vector<16x128xf32> -> vector<16x128xf32>
    %c8 = arith.constant 8 : index
    %c0_31 = arith.constant 0 : index
    %c0_32 = arith.constant 0 : index
    %31 = vector.load %arg4[%c8, %c0_31, %c0_32] : memref<9x16x16xf32, #tpu.memory_space<vmem>>, vector<1x16x16xf32>
    %32 = vector.shape_cast %31 : vector<1x16x16xf32> to vector<16x16xf32>
    %cst_33 = arith.constant dense<0.000000e+00> : vector<16x128xf32>
    %33 = tpu.matmul %32, %6, %cst_33 {dimension_numbers = #tpu.dot_dimension_numbers<[1], [0], [0], [1], [0, 0, 1, 1], [], []>} : vector<16x16xf32>, vector<16x128xf32>, vector<16x128xf32> -> vector<16x128xf32>
    %34 = tpu.concatenate %9, %12, %15, %18, %21, %24, %27, %30, %33 in 1 : vector<16x128xf32>, vector<16x128xf32>, vector<16x128xf32>, vector<16x128xf32>, vector<16x128xf32>, vector<16x128xf32>, vector<16x128xf32>, vector<16x128xf32>, vector<16x128xf32> -> vector<16x1152xf32>
    %c0_34 = arith.constant 0 : index
    %c0_35 = arith.constant 0 : index
    %35 = vector.load %arg5[%c0_34, %c0_35] : memref<1152x128xf32, #tpu.memory_space<vmem>>, vector<1152x128xf32>
    %cst_36 = arith.constant dense<0.000000e+00> : vector<16x128xf32>
    %36 = tpu.matmul %34, %35, %cst_36 {dimension_numbers = #tpu.dot_dimension_numbers<[1], [0], [0], [1], [0, 0, 1, 1], [], []>} : vector<16x1152xf32>, vector<1152x128xf32>, vector<16x128xf32> -> vector<16x128xf32>
    %c0_37 = arith.constant 0 : index
    %c0_38 = arith.constant 0 : index
    %37 = vector.load %arg6[%c0_37, %c0_38] : memref<128x128xf32, #tpu.memory_space<vmem>>, vector<128x128xf32>
    %cst_39 = arith.constant dense<0.000000e+00> : vector<16x128xf32>
    %38 = tpu.matmul %36, %37, %cst_39 {dimension_numbers = #tpu.dot_dimension_numbers<[1], [0], [0], [1], [0, 0, 1, 1], [], []>} : vector<16x128xf32>, vector<128x128xf32>, vector<16x128xf32> -> vector<16x128xf32>
    %39 = arith.subf %36, %38 : vector<16x128xf32>
    %40 = arith.mulf %39, %39 : vector<16x128xf32>
    %c0_40 = arith.constant 0 : index
    %c0_41 = arith.constant 0 : index
    %41 = vector.load %arg6[%c0_40, %c0_41] : memref<128x128xf32, #tpu.memory_space<vmem>>, vector<128x128xf32>
    %cst_42 = arith.constant dense<0.000000e+00> : vector<16x128xf32>
    %42 = tpu.matmul %40, %41, %cst_42 {dimension_numbers = #tpu.dot_dimension_numbers<[1], [0], [0], [1], [0, 0, 1, 1], [], []>} : vector<16x128xf32>, vector<128x128xf32>, vector<16x128xf32> -> vector<16x128xf32>
    %43 = math.sqrt %42 : vector<16x128xf32>
    %cst_43 = arith.constant 9.99999974E-6 : f32
    %44 = vector.broadcast %cst_43 : f32 to vector<16x128xf32>
    %45 = arith.addf %43, %44 : vector<16x128xf32>
    %46 = tpu.reciprocal %45 {approx = true} : vector<16x128xf32> -> vector<16x128xf32>
    %47 = arith.mulf %45, %46 : vector<16x128xf32>
    %cst_44 = arith.constant 2.000000e+00 : f32
    %48 = vector.broadcast %cst_44 : f32 to vector<16x128xf32>
    %49 = arith.subf %48, %47 : vector<16x128xf32>
    %50 = arith.mulf %46, %49 : vector<16x128xf32>
    %51 = arith.mulf %39, %50 : vector<16x128xf32>
    %c0_45 = arith.constant 0 : index
    %c0_46 = arith.constant 0 : index
    %52 = vector.load %arg7[%c0_45, %c0_46] : memref<1x128xf32, #tpu.memory_space<vmem>>, vector<1x128xf32>
    %53 = vector.broadcast %52 : vector<1x128xf32> to vector<16x128xf32>
    %54 = arith.mulf %51, %53 : vector<16x128xf32>
    %c0_47 = arith.constant 0 : index
    %c0_48 = arith.constant 0 : index
    %55 = vector.load %arg8[%c0_47, %c0_48] : memref<1x128xf32, #tpu.memory_space<vmem>>, vector<1x128xf32>
    %56 = vector.broadcast %55 : vector<1x128xf32> to vector<16x128xf32>
    %57 = arith.addf %54, %56 : vector<16x128xf32>
    %cst_49 = arith.constant 5.000000e-01 : f32
    %58 = vector.broadcast %cst_49 : f32 to vector<16x128xf32>
    %59 = arith.mulf %58, %57 : vector<16x128xf32>
    %cst_50 = arith.constant 0.707106769 : f32
    %60 = vector.broadcast %cst_50 : f32 to vector<16x128xf32>
    %61 = arith.mulf %57, %60 : vector<16x128xf32>
    %62 = math.erf %61 : vector<16x128xf32>
    %cst_51 = arith.constant 1.000000e+00 : f32
    %63 = vector.broadcast %cst_51 : f32 to vector<16x128xf32>
    %64 = arith.addf %63, %62 : vector<16x128xf32>
    %65 = arith.mulf %59, %64 : vector<16x128xf32>
    %66 = vector.shape_cast %65 : vector<16x128xf32> to vector<1x16x128xf32>
    %c0_52 = arith.constant 0 : index
    %c0_53 = arith.constant 0 : index
    %c0_54 = arith.constant 0 : index
    %67 = vector.load %arg9[%c0_52, %c0_53, %c0_54] : memref<1x16x128xf32, #tpu.memory_space<vmem>>, vector<1x16x128xf32>
    tpu.vector_store %arg9[%c0_52, %c0_53, %c0_54], %66 {strides = array<i32>} : memref<1x16x128xf32, #tpu.memory_space<vmem>>, vector<1x16x128xf32>,
    return
  }
  func.func @transform_0(%arg0: i32) -> (i32, i32, i32) {
    %c0_i32 = arith.constant 0 : i32
    %c0_i32_0 = arith.constant 0 : i32
    %c0_i32_1 = arith.constant 0 : i32
    return %arg0, %c0_i32, %c0_i32_0 : i32, i32, i32
  }
  func.func @transform_1(%arg0: i32) -> (i32, i32) {
    %c0_i32 = arith.constant 0 : i32
    %c0_i32_0 = arith.constant 0 : i32
    %c0_i32_1 = arith.constant 0 : i32
    return %c0_i32, %c0_i32_0 : i32, i32
  }
  func.func @transform_2(%arg0: i32) -> (i32, i32) {
    %c0_i32 = arith.constant 0 : i32
    %c0_i32_0 = arith.constant 0 : i32
    %c0_i32_1 = arith.constant 0 : i32
    return %c0_i32, %c0_i32_0 : i32, i32
  }
  func.func @transform_3(%arg0: i32) -> (i32, i32, i32) {
    %c0_i32 = arith.constant 0 : i32
    %c0_i32_0 = arith.constant 0 : i32
    %c0_i32_1 = arith.constant 0 : i32
    %c0_i32_2 = arith.constant 0 : i32
    return %c0_i32, %c0_i32_0, %c0_i32_1 : i32, i32, i32
  }
  func.func @transform_4(%arg0: i32) -> (i32, i32) {
    %c0_i32 = arith.constant 0 : i32
    %c0_i32_0 = arith.constant 0 : i32
    %c0_i32_1 = arith.constant 0 : i32
    return %c0_i32, %c0_i32_0 : i32, i32
  }
  func.func @transform_5(%arg0: i32) -> (i32, i32) {
    %c0_i32 = arith.constant 0 : i32
    %c0_i32_0 = arith.constant 0 : i32
    %c0_i32_1 = arith.constant 0 : i32
    return %c0_i32, %c0_i32_0 : i32, i32
  }
  func.func @transform_6(%arg0: i32) -> (i32, i32) {
    %c0_i32 = arith.constant 0 : i32
    %c0_i32_0 = arith.constant 0 : i32
    %c0_i32_1 = arith.constant 0 : i32
    return %c0_i32, %c0_i32_0 : i32, i32
  }
  func.func @transform_7(%arg0: i32) -> (i32, i32) {
    %c0_i32 = arith.constant 0 : i32
    %c0_i32_0 = arith.constant 0 : i32
    %c0_i32_1 = arith.constant 0 : i32
    return %c0_i32, %c0_i32_0 : i32, i32
  }
  func.func @transform_8(%arg0: i32) -> (i32, i32, i32) {
    %c0_i32 = arith.constant 0 : i32
    %c0_i32_0 = arith.constant 0 : i32
    %c0_i32_1 = arith.constant 0 : i32
    return %arg0, %c0_i32, %c0_i32_0 : i32, i32, i32
  }
}

</mosaic_0001>

<bundles_post_ra>
// kernel: tpu_custom_call.1
= control target key start
LH: loop header
LB: loop body
LE: loop exit
PB: predicated region body
PF: predicated region fallthrough
CT: control target
= control target key end

     0   :  { %s2064_s0 = inlined_call_operand.hbm [shape: f32[2,16,64], index: 0, kind: input, shape index: {}]   ;;  %s2065_s1 = inlined_call_operand.hbm [shape: f32[64,128], index: 1, kind: input, shape index: {}]   ;;  %s2066_s2 = inlined_call_operand.vmem [shape: f32[1,128], index: 2, kind: input, shape index: {}]   ;;  %s2067_s3 = inlined_call_operand.hbm [shape: f32[9,16,16], index: 3, kind: input, shape index: {}]   ;;  %s2068_s4 = inlined_call_operand.hbm [shape: f32[1152,128], index: 4, kind: input, shape index: {}]   ;;  %s2069_s5 = inlined_call_operand.hbm [shape: f32[128,128], index: 5, kind: input, shape index: {}]   ;;  %s2070_s6 = inlined_call_operand.vmem [shape: f32[1,128], index: 6, kind: input, shape index: {}]   ;;  %s2071_s7 = inlined_call_operand.vmem [shape: f32[1,128], index: 7, kind: input, shape index: {}]   ;;  %s2072_s8 = inlined_call_operand.hbm [shape: f32[2,16,128], index: 8, kind: output, shape index: {}]  }
   0x1   :  { %2075 = sst [smem:[#allocation16_spill]] %s2065_s1 }
   0x2   :  { %2076 = sst [smem:[#allocation17_spill]] %s2067_s3 }
   0x3   :  { %13 = vsyncpa [#allocation3], 0 }
   0x4   :  { %15 = vsyncpa [#allocation3 + $0x1], 0 }
   0x5   :  { %16 = vsyncpa [#allocation6], 0 }
   0x6   :  { %17 = vsyncpa [#allocation9], 0 }
   0x7   :  { %18 = vsyncpa [#allocation4], 0 }
   0x8   :  { %20 = vsyncpa [#allocation4 + $0x1], 0  ;;  %s1837_s27 = smov 0   ;;  %s1839_s28 = smov 0  }
   0x9   :  { %s1841_s29 = smov 0   ;;  %s1843_s30 = smov 0  }
   0xa LB: > { %s1858_s9 = sadd.s32 4294967295, %s1782_s30   ;;  %s1406_s10 = sadd.s32 4294967294, %s1782_s30   ;;  %s1782_s30 = sphi %s1843_s30, %s2091_s30   ;;  %s1778_s29 = sphi %s1841_s29, %s2090_s29   ;;  %s1774_s28 = sphi %s1839_s28, %s2089_s28   ;;  %s1770_s27 = sphi %s1837_s27, %s2088_s27  }
   0xb   : > { %p46_p0 = scmp.ne.s32.totalorder %s1774_s28, %s1770_s27  ;;  %p47_p1 = scmp.eq.s32.totalorder %s1858_s9, 0 }
   0xc   : > { %p217_p2 = scmp.eq.s32.totalorder %s1858_s9, 1  ;;  %p223_p3 = scmp.eq.s32.totalorder %s1406_s10, 1 }
   0xd   : > { %p1867_p4 = por %p47_p1, %p46_p0  ;;  %p1407_p5 = scmp.ge.s32.totalorder %s1782_s30, 1 }
   0xe   : > { %p1872_p6 = por %p223_p3, %p46_p0  ;;  %p230_p7 = scmp.lt.s32.totalorder %s1782_s30, 3 }
   0xf   : > { %s2079_s1 = sld [smem:[#allocation16_spill]]  ;;  %s1784_s17 = smov [#allocation5]  }
  0x10   : > { %p1880_p8 = pnand %p1407_p5, %p230_p7  ;;  %s243_s18 = sshll.u32 %s1784_s17, 4  ;;  %s244_s18 = int_to_ptr.vmem [resolvable:$true] %s243_s18 }
  0x11   : > { %s272_s22 = sshll.u32 %s2068_s4, 4  ;;  %s2073_s23 = smov 128   ;;  %s273_s22 = int_to_ptr.hbm [resolvable:$true] %s272_s22 }
  0x12   : > { %p1472_p9 = pneg %p1880_p8  ;;  %s2074_s24 = smov 8  }
  0x13   : > { %s1787_s25 = smov [#allocation8]   ;;  %s2082_s3 = sld [smem:[#allocation17_spill]] }
  0x14   : > { %p1888_p10 = pnand %p1472_p9, %p47_p1  ;;  %s274_s26 = sshll.u32 %s1787_s25, 4  ;;  %s275_s26 = int_to_ptr.vmem [resolvable:$true] %s274_s26 }
  0x15   : > { %s241_s15 = sshll.u32 %s2079_s1, 4  ;;  %s1788_s20 = smov [#allocation7]   ;;  %s242_s15 = int_to_ptr.hbm [resolvable:$true] %s241_s15 }
  0x16   : > { %1475 = dma.hbm_to_vmem [thread:$0]  (!%p1888_p10), %s242_s15, 1024, %s244_s18, [#allocation6], %s2073_s23, %s2073_s23, %s2074_s24  }
  0x17   : > { %1481 = dma.hbm_to_vmem [thread:$0]  (!%p1888_p10), %s273_s22, 18432, %s275_s26, [#allocation9], %s2073_s23, %s2073_s23, %s2074_s24  }
  0x18   : > { %s286_s18 = sshll.u32 %s2069_s5, 4  ;;  %s260_s21 = sshll.u32 %s1788_s20, 4  ;;  %s287_s18 = int_to_ptr.hbm [resolvable:$true] %s286_s18  ;;  %s261_s21 = int_to_ptr.vmem [resolvable:$true] %s260_s21 }
  0x19   : > { %s258_s14 = sshll.u32 %s2082_s3, 4  ;;  %s1789_s25 = smov [#allocation10]   ;;  %s259_s14 = int_to_ptr.hbm [resolvable:$true] %s258_s14 }
  0x1a   : > { %1478 = dma.hbm_to_vmem [thread:$0]  (!%p1888_p10), %s259_s14, 2304, %s261_s21, [#allocation6], %s2073_s23, %s2073_s23, %s2074_s24  }
  0x1b   : > { %s288_s22 = sshll.u32 %s1789_s25, 4  ;;  %s1923_s26 = sadd.s32 1, %s1782_s30   ;;  %s289_s22 = int_to_ptr.vmem [resolvable:$true] %s288_s22 }
  0x1c   : > { %1484 = dma.hbm_to_vmem [thread:$0]  (!%p1888_p10), %s287_s18, 2048, %s289_s22, [#allocation9], %s2073_s23, %s2073_s23, %s2074_s24  }
  0x1d   : > { %s33_s10 = sadd.s32 1, %s1778_s29  ;;  %s30_s13 = ssub.s32 %s1782_s30, %s1923_s26 }
  0x1e   : > { %p40_p12 = scmp.ne.s32.totalorder %s1778_s29, %s1774_s28  ;;  %p31_p13 = scmp.eq.s32.totalorder %s30_s13, 0 }
  0x1f   : > { %p41_p0 = scmp.eq.s32.totalorder %s1782_s30, 0  ;;  %p1497_p5 = scmp.lt.s32.totalorder %s1782_s30, 2 }
  0x20   : > { %p1933_p3 = por %p217_p2, %p40_p12  ;;  %s308_s19 = sand.u32 1, %s1778_s29  }
  0x21   : > { %s1939_s15 = scalar_select %p31_p13, %s1778_s29, %s33_s10  }
  0x22   : > { %p42_p7 = por %p41_p0, %p40_p12  ;;  %s1413_s17 = sshll.u32 %s308_s19, 4 }
  0x23   : > { %s1450_s18 = sshll.u32 %s1782_s30, 4  ;;  %s312_s22 = scalar_lea.vmem [#allocation2], %s1413_s17 }
  0x24   : > { %s317_s25 = scalar_lea.hbm %s2064_s0, %s1450_s18  ;;  %s320_s23 = sshll.u32 %s312_s22, 4  ;;  %s321_s23 = int_to_ptr.vmem [resolvable:$true] %s320_s23 }
  0x25   : > { %s318_s13 = sshll.u32 %s317_s25, 4  ;;  %p1946_p2 = pnand %p1497_p5, %p42_p7  ;;  %s319_s13 = int_to_ptr.hbm [resolvable:$true] %s318_s13 }
  0x26   : > { %s309_s10 = scalar_lea.sflag [#allocation3], %s308_s19  ;;  %s1678_s1 = sshra.s32 %s319_s13, 4  ;;  %s1679_s1 = int_to_ptr.hbm [resolvable:$true] %s1678_s1 }
  0x27   : > { %s1680_s3 = scalar_lea.hbm %s1679_s1, 16  ;;  %p1682_p10 = pneg %p1946_p2 }
  0x28   : > { %p1681_p9 = scmp.ne.s32.totalorder %s1679_s1, %s1680_s3  ;;  %s1685_s20 = scalar_lea.hbm %s2064_s0, 32 }
  0x29   : > { %p1686_p0 = scmp.lt.s32.totalorder %s1679_s1, %s2064_s0  ;;  %p1687_p5 = scmp.lt.s32.totalorder %s1685_s20, %s1680_s3 }
  0x2a   : > { %p1683_p12 = pnand %p1682_p10, %p1681_p9 }
  0x2b   : > { %p1688_p7 = por %p1687_p5, %p1686_p0 }
  0x2c   : > { %p1684_p13 = pneg %p1683_p12 }
  0x2e   : > { %p1689_p11 = pnand %p1688_p7, %p1684_p13 }
  0x30   : > { %1692 = shalt.err (!%p1689_p11)
}
  0x31   : > { %s2085_s19 = smov 8   ;;  %s2086_s22 = smov 128  }
  0x32   : > { %1488 = dma.hbm_to_vmem [thread:$0]  (!%p1946_p2), %s319_s13, 256, %s321_s23, %s309_s10, %s2086_s22, %s2086_s22, %s2085_s19  }
  0x33   : > { %332 = sbr.rel (%p1880_p8) target bundleno = 892 (0x37c), region = 52  ;;  %s1966_s18 = sand.u32 (!%p1880_p8), 1, %s1774_s28  }
  0x34   : > { %s1417_s1 = sshll.u32 (!%p1880_p8), %s1966_s18, 4  ;;  %s335_s3 = scalar_lea.sflag (!%p1880_p8), [#allocation3], %s1966_s18 }
  0x35   : > { %s338_s17 = scalar_lea.vmem (!%p1880_p8), [#allocation2], %s1417_s1 }
  0x38   : > { %1753 = dma.done.wait (%p1867_p4), %s335_s3, 256  }
  0x39   : > { %1755 = vsyncadd (%p1867_p4), %s335_s3, 4294967040 }
  0x3a   : > { %1757 = dma.done.wait (%p47_p1), [#allocation6], 3328  }
  0x3b   : > { %1759 = vsyncadd (%p47_p1), [#allocation6], 4294963968 }
  0x3c   : > { %1761 = dma.done.wait (%p47_p1), [#allocation9], 20480  }
  0x3d   : > { %1763 = vsyncadd (%p47_p1), [#allocation9], 4294946816  ;;  %v401_v0 = vld [vmem:[#allocation5 + $0x38] sm:$0xff]  ;;  %v400_v1 = vld [vmem:[#allocation5 + $0x30] sm:$0xff]  ;;  %vm406_vm0 = vcmask 523264   ;;  %vm438_vm1 = vcmask 130048  }
  0x3e   : > { %421 = vmatpush.msra.mxu0 %v401_v0  ;;  %v399_v2 = vld [vmem:[#allocation5 + $0x28] sm:$0xff]  ;;  %v398_v3 = vld [vmem:[#allocation5 + $0x20] sm:$0xff]  ;;  %v397_v4 = vld [vmem:[#allocation5 + $0x18] sm:$0xff]  ;;  %s1451_s20 = sshll.u32 %s1858_s9, 4  ;;  %s391_s22 = scalar_lea.vmem [#allocation11], %s1417_s1 }
  0x3f   : > { %v396_v5 = vld [vmem:[#allocation5 + $0x10] sm:$0xff]  ;;  %v395_v6 = vld [vmem:[#allocation5 + $0x8] sm:$0xff]  ;;  %v394_v7 = vld [vmem:[#allocation5] sm:$0xff]  ;;  %s1291_s19 = scalar_lea.hbm %s2072_s8, %s1451_s20  ;;  %s1292_s9 = sshll.u32 %s391_s22, 4  ;;  %s1293_s9 = int_to_ptr.vmem [resolvable:$true] %s1292_s9 }
  0x40   : > { %422 = vmatpush.msra.mxu0 %v400_v1  ;;  %v392_v8 = vld [vmem:[%s338_s17] sm:$0xff]  ;;  %v393_v9 = vld [vmem:[%s338_s17 + $0x8] sm:$0xff]  ;;  %s1294_s3 = sshll.u32 %s1291_s19, 4  ;;  %s1280_s17 = scalar_lea.sflag [#allocation4], %s1966_s18  ;;  %s1295_s3 = int_to_ptr.hbm [resolvable:$true] %s1294_s3 }
  0x41   : > { %v1543_v11 = vld [vmem:[%s2066_s2] ss:$0 sm:$0xff]  ;;  %v533_v16 = vld [vmem:[#allocation7 + $0x30] sm:$0xff]  ;;  %v437_v18 = vld [vmem:[#allocation7 + $0x8] sm:$0xff]  ;;  %s1722_s11 = sshra.s32 %s1295_s3, 4  ;;  %s1728_s24 = scalar_lea.hbm %s2072_s8, 32  ;;  %s1723_s11 = int_to_ptr.hbm [resolvable:$true] %s1722_s11 }
  0x42   : > { %423 = vmatpush.msra.mxu0 %v399_v2  ;;  %v436_v15 = vld [vmem:[#allocation7] sm:$0xff]  ;;  %v534_v19 = vld [vmem:[#allocation7 + $0x38] sm:$0xff]  ;;  %v502_v20 = vld [vmem:[#allocation7 + $0x28] sm:$0xff]  ;;  %s1724_s16 = scalar_lea.hbm %s1723_s11, 16  ;;  %p1729_p11 = scmp.lt.s32.totalorder %s1723_s11, %s2072_s8 }
  0x43   : > { %v501_v17 = vld [vmem:[#allocation7 + $0x20] sm:$0xff]  ;;  %v469_v22 = vld [vmem:[#allocation7 + $0x10] sm:$0xff]  ;;  %v630_v24 = vld [vmem:[#allocation7 + $0x68] sm:$0xff]  ;;  %p1725_p1 = scmp.ne.s32.totalorder %s1723_s11, %s1724_s16  ;;  %p1730_p2 = scmp.lt.s32.totalorder %s1728_s24, %s1724_s16 }
  0x44   : > { %424 = vmatpush.msra.mxu0 %v398_v3  ;;  %v629_v21 = vld [vmem:[#allocation7 + $0x60] sm:$0xff]  ;;  %v661_v23 = vld [vmem:[#allocation7 + $0x70] sm:$0xff]  ;;  %v470_v26 = vld [vmem:[#allocation7 + $0x18] sm:$0xff] }
  0x45   : > { %v597_v25 = vld [vmem:[#allocation7 + $0x50] sm:$0xff]  ;;  %v662_v27 = vld [vmem:[#allocation7 + $0x78] sm:$0xff]  ;;  %v739_v28 = vld [vmem:[#allocation8 + $0x78] sm:$0xff]  ;;  %p1726_p4 = pnand %p1725_p1, %p1933_p3  ;;  %p1731_p9 = por %p1730_p2, %p1729_p11 }
  0x46   : > { %425 = vmatpush.msra.mxu0 %v397_v4  ;;  %v738_v29 = vld [vmem:[#allocation8 + $0x70] sm:$0xff]  ;;  %v598_v30 = vld [vmem:[#allocation7 + $0x58] sm:$0xff]  ;;  %v736_v32 = vld [vmem:[#allocation8 + $0x60] sm:$0xff] }
  0x47   : > { %v737_v31 = vld [vmem:[#allocation8 + $0x68] sm:$0xff]  ;;  %v755_v33 = vld [vmem:[#allocation8 + $0xf8] sm:$0xff]  ;;  %v565_v34 = vld [vmem:[#allocation7 + $0x40] sm:$0xff]  ;;  %p1727_p8 = pneg %p1726_p4 }
  0x48   : > { %426 = vmatpush.msra.mxu0 %v396_v5  ;;  %v754_v35 = vld [vmem:[#allocation8 + $0xf0] sm:$0xff]  ;;  %v771_v36 = vld [vmem:[#allocation8 + $0x178] sm:$0xff]  ;;  %v753_v39 = vld [vmem:[#allocation8 + $0xe8] sm:$0xff] }
  0x49   : > { %v735_v37 = vld [vmem:[#allocation8 + $0x58] sm:$0xff]  ;;  %v770_v40 = vld [vmem:[#allocation8 + $0x170] sm:$0xff]  ;;  %v769_v43 = vld [vmem:[#allocation8 + $0x168] sm:$0xff]  ;;  %p1732_p10 = pnand %p1731_p9, %p1727_p8 }
  0x4a   : > { %427 = vmatpush.msra.mxu0 %v395_v6  ;;  %v787_v38 = vld [vmem:[#allocation8 + $0x1f8] sm:$0xff]  ;;  %v734_v41 = vld [vmem:[#allocation8 + $0x50] sm:$0xff]  ;;  %v752_v44 = vld [vmem:[#allocation8 + $0xe0] sm:$0xff] }
  0x4b   : > { %v786_v42 = vld [vmem:[#allocation8 + $0x1f0] sm:$0xff]  ;;  %v768_v45 = vld [vmem:[#allocation8 + $0x160] sm:$0xff]  ;;  %v733_v46 = vld [vmem:[#allocation8 + $0x48] sm:$0xff] }
  0x4c   : > { %428 = vmatpush.msra.mxu0 %v394_v7  ;;  %v785_v47 = vld [vmem:[#allocation8 + $0x1e8] sm:$0xff]  ;;  %v751_v48 = vld [vmem:[#allocation8 + $0xd8] sm:$0xff]  ;;  %v732_v50 = vld [vmem:[#allocation8 + $0x40] sm:$0xff] }
  0x4d   : > { %1423 = vmatmul.msk.f32.vlgmr.msra.gmra.mxu0 %vm406_vm0, %v392_v8  ;;  %v767_v49 = vld [vmem:[#allocation8 + $0x158] sm:$0xff]  ;;  %v784_v51 = vld [vmem:[#allocation8 + $0x1e0] sm:$0xff]  ;;  %v750_v53 = vld [vmem:[#allocation8 + $0xd0] sm:$0xff] }
  0x4e   : > { %v566_v52 = vld [vmem:[#allocation7 + $0x48] sm:$0xff]  ;;  %v749_v56 = vld [vmem:[#allocation8 + $0xc8] sm:$0xff]  ;;  %v766_v57 = vld [vmem:[#allocation8 + $0x150] sm:$0xff] }
  0x4f   : > { %v731_v54 = vld [vmem:[#allocation8 + $0x38] sm:$0xff]  ;;  %v730_v58 = vld [vmem:[#allocation8 + $0x30] sm:$0xff]  ;;  %v748_v60 = vld [vmem:[#allocation8 + $0xc0] sm:$0xff] }
  0x50   : > { %v783_v55 = vld [vmem:[#allocation8 + $0x1d8] sm:$0xff]  ;;  %v782_v59 = vld [vmem:[#allocation8 + $0x1d0] sm:$0xff]  ;;  %v765_v61 = vld [vmem:[#allocation8 + $0x148] sm:$0xff] }
  0x51   : > { %v729_v62 = vld [vmem:[#allocation8 + $0x28] sm:$0xff]  ;;  %v747_v0 = vld [vmem:[#allocation8 + $0xb8] sm:$0xff]  ;;  %v764_v1 = vld [vmem:[#allocation8 + $0x140] sm:$0xff] }
  0x52   : > { %v781_v63 = vld [vmem:[#allocation8 + $0x1c8] sm:$0xff]  ;;  %v728_v2 = vld [vmem:[#allocation8 + $0x20] sm:$0xff]  ;;  %v693_v4 = vld [vmem:[#allocation7 + $0x80] sm:$0xff] }
  0x53   : > { %v780_v3 = vld [vmem:[#allocation8 + $0x1c0] sm:$0xff]  ;;  %v746_v5 = vld [vmem:[#allocation8 + $0xb0] sm:$0xff]  ;;  %v727_v6 = vld [vmem:[#allocation8 + $0x18] sm:$0xff] }
  0x54   : > { %v779_v7 = vld [vmem:[#allocation8 + $0x1b8] sm:$0xff] }
  0x55   : > { %1424 = vmatmul.msk.f32.gmra.mxu0 %vm406_vm0, %v393_v9  ;;  %v763_v8 = vld [vmem:[#allocation8 + $0x138] sm:$0xff]  ;;  %v745_v9 = vld [vmem:[#allocation8 + $0xa8] sm:$0xff] }
  0xca   : > { %v430_v10 = vpop.f32.mrf.mxu0 }
  0xcb   : > { %v431_v14 = vadd.f32 %v1543_v11, %v430_v10  ;;  %v726_v10 = vld [vmem:[#allocation8 + $0x10] sm:$0xff] }
  0xd2   : > { %v433_v12 = vpop.f32.mrf.mxu0 }
  0xd3   : > { %v434_v13 = vadd.f32 %v1543_v11, %v433_v12  ;;  %v778_v11 = vld [vmem:[#allocation8 + $0x1b0] sm:$0xff] }
  0xd4   : > { %v762_v12 = vld [vmem:[#allocation8 + $0x130] sm:$0xff] }
  0xd5   : > { %459 = vmatpush.msra.mxu2 %v434_v13  ;;  %523 = vmatpush.msra.mxu3 %v434_v13 }
  0xd6   : > { %555 = vmatpush.msra.mxu1 %v434_v13  ;;  %651 = vmatpush.msrb.mxu0 %v434_v13 }
  0xd7   : > { %460 = vmatpush.msra.mxu2 %v431_v14  ;;  %524 = vmatpush.msra.mxu3 %v431_v14 }
  0xd8   : > { %556 = vmatpush.msra.mxu1 %v431_v14  ;;  %652 = vmatpush.msrb.mxu0 %v431_v14 }
  0xd9   : > { %1425 = vmatmul.msk.f32.vlgmr.msra.gmra.mxu2 %vm438_vm1, %v436_v15  ;;  %619 = vmatpush.msrb.mxu3 %v434_v13  ;;  %v724_v15 = vld [vmem:[#allocation8] sm:$0xff] }
  0xda   : > { %491 = vmatpush.msrb.mxu2 %v434_v13  ;;  %683 = vmatpush.msrb.mxu1 %v434_v13 }
  0xdb   : > { %620 = vmatpush.msrb.mxu3 %v431_v14  ;;  %1431 = vmatmul.msk.f32.vlgmr.msra.gmra.mxu1 %vm438_vm1, %v533_v16  ;;  %v776_v16 = vld [vmem:[#allocation8 + $0x1a0] sm:$0xff] }
  0xdc   : > { %492 = vmatpush.msrb.mxu2 %v431_v14  ;;  %684 = vmatpush.msrb.mxu1 %v431_v14 }
  0xdd   : > { %1429 = vmatmul.msk.f32.vlgmr.msra.gmra.mxu3 %vm438_vm1, %v501_v17  ;;  %1437 = vmatmul.msk.f32.vlgmr.msrb.gmra.mxu0 %vm438_vm1, %v629_v21  ;;  %v694_v17 = vld [vmem:[#allocation7 + $0x88] sm:$0xff]  ;;  %v800_v21 = vld [vmem:[#allocation8 + $0x260] sm:$0xff] }
  0xde   : > { %587 = vmatpush.msra.mxu2 %v434_v13  ;;  %868 = vmatpush.msra.mxu3 %v739_v28  ;;  %v796_v28 = vld [vmem:[#allocation8 + $0x240] sm:$0xff] }
  0xdf   : > { %891 = vmatpush.msra.mxu0 %v755_v33  ;;  %914 = vmatpush.msra.mxu1 %v771_v36  ;;  %v742_v33 = vld [vmem:[#allocation8 + $0x90] sm:$0xff] }
  0xe0   : > { %588 = vmatpush.msra.mxu2 %v431_v14  ;;  %869 = vmatpush.msra.mxu3 %v738_v29  ;;  %v743_v29 = vld [vmem:[#allocation8 + $0x98] sm:$0xff]  ;;  %v794_v36 = vld [vmem:[#allocation8 + $0x230] sm:$0xff] }
  0xe1   : > { %1426 = vmatmul.msk.f32.gmra.mxu2 %vm438_vm1, %v437_v18  ;;  %892 = vmatpush.msra.mxu0 %v754_v35  ;;  %v803_v18 = vld [vmem:[#allocation8 + $0x278] sm:$0xff]  ;;  %v773_v35 = vld [vmem:[#allocation8 + $0x188] sm:$0xff] }
  0xe2   : > { %870 = vmatpush.msra.mxu3 %v737_v31  ;;  %915 = vmatpush.msra.mxu1 %v770_v40  ;;  %v774_v31 = vld [vmem:[#allocation8 + $0x190] sm:$0xff]  ;;  %v793_v40 = vld [vmem:[#allocation8 + $0x228] sm:$0xff] }
  0xe3   : > { %1432 = vmatmul.msk.f32.gmra.mxu1 %vm438_vm1, %v534_v19  ;;  %893 = vmatpush.msra.mxu0 %v753_v39  ;;  %v802_v19 = vld [vmem:[#allocation8 + $0x270] sm:$0xff]  ;;  %v772_v39 = vld [vmem:[#allocation8 + $0x180] sm:$0xff] }
  0xe4   : > { %871 = vmatpush.msra.mxu3 %v736_v32  ;;  %916 = vmatpush.msra.mxu1 %v769_v43  ;;  %v795_v32 = vld [vmem:[#allocation8 + $0x238] sm:$0xff]  ;;  %v757_v43 = vld [vmem:[#allocation8 + $0x108] sm:$0xff] }
  0xe5   : > { %1430 = vmatmul.msk.f32.gmra.mxu3 %vm438_vm1, %v502_v20  ;;  %1438 = vmatmul.msk.f32.gmra.mxu0 %vm438_vm1, %v630_v24  ;;  %v801_v20 = vld [vmem:[#allocation8 + $0x268] sm:$0xff] }
  0xe6   : > { %872 = vmatpush.msra.mxu3 %v735_v37  ;;  %894 = vmatpush.msra.mxu0 %v752_v44  ;;  %v797_v24 = vld [vmem:[#allocation8 + $0x248] sm:$0xff]  ;;  %v792_v44 = vld [vmem:[#allocation8 + $0x220] sm:$0xff] }
  0xe7   : > { %917 = vmatpush.msra.mxu1 %v768_v45  ;;  %v741_v37 = vld [vmem:[#allocation8 + $0x88] sm:$0xff]  ;;  %v819_v45 = vld [vmem:[#allocation8 + $0x2f8] sm:$0xff] }
  0xe8   : > { %873 = vmatpush.msra.mxu3 %v734_v41  ;;  %895 = vmatpush.msra.mxu0 %v751_v48  ;;  %v851_v41 = vld [vmem:[#allocation8 + $0x3f8] sm:$0xff] }
  0xe9   : > { %1427 = vmatmul.msk.f32.vlgmr.msrb.gmra.mxu2 %vm438_vm1, %v469_v22  ;;  %918 = vmatpush.msra.mxu1 %v767_v49  ;;  %v799_v22 = vld [vmem:[#allocation8 + $0x258] sm:$0xff]  ;;  %v818_v49 = vld [vmem:[#allocation8 + $0x2f0] sm:$0xff] }
  0xea   : > { %715 = vmatpush.msrb.mxu2 %v434_v13  ;;  %874 = vmatpush.msra.mxu3 %v733_v46  ;;  %v725_v13 = vld [vmem:[#allocation8 + $0x8] sm:$0xff]  ;;  %v850_v46 = vld [vmem:[#allocation8 + $0x3f0] sm:$0xff]  ;;  %v791_v48 = vld [vmem:[#allocation8 + $0x218] sm:$0xff] }
  0xeb   : > { %1439 = vmatmul.msk.f32.vlgmr.msrb.gmra.mxu1 %vm438_vm1, %v661_v23  ;;  %896 = vmatpush.msra.mxu0 %v750_v53  ;;  %v798_v23 = vld [vmem:[#allocation8 + $0x250] sm:$0xff]  ;;  %v817_v53 = vld [vmem:[#allocation8 + $0x2e8] sm:$0xff] }
  0xec   : > { %716 = vmatpush.msrb.mxu2 %v431_v14  ;;  %875 = vmatpush.msra.mxu3 %v732_v50  ;;  %v777_v14 = vld [vmem:[#allocation8 + $0x1a8] sm:$0xff]  ;;  %v835_v50 = vld [vmem:[#allocation8 + $0x378] sm:$0xff] }
  0xed   : > { %1435 = vmatmul.msk.f32.vlgmr.msrb.gmra.mxu3 %vm438_vm1, %v597_v25  ;;  %897 = vmatpush.msra.mxu0 %v749_v56  ;;  %v744_v25 = vld [vmem:[#allocation8 + $0xa0] sm:$0xff]  ;;  %v789_v56 = vld [vmem:[#allocation8 + $0x208] sm:$0xff] }
  0xee   : > { %876 = vmatpush.msra.mxu3 %v731_v54  ;;  %919 = vmatpush.msra.mxu1 %v766_v57  ;;  %v834_v54 = vld [vmem:[#allocation8 + $0x370] sm:$0xff]  ;;  %v816_v57 = vld [vmem:[#allocation8 + $0x2e0] sm:$0xff] }
  0xef   : > { %898 = vmatpush.msra.mxu0 %v748_v60  ;;  %v788_v60 = vld [vmem:[#allocation8 + $0x200] sm:$0xff] }
  0xf0   : > { %877 = vmatpush.msra.mxu3 %v730_v58  ;;  %920 = vmatpush.msra.mxu1 %v765_v61  ;;  %v833_v58 = vld [vmem:[#allocation8 + $0x368] sm:$0xff]  ;;  %v815_v61 = vld [vmem:[#allocation8 + $0x2d8] sm:$0xff] }
  0xf1   : > { %1428 = vmatmul.msk.f32.gmra.mxu2 %vm438_vm1, %v470_v26  ;;  %899 = vmatpush.msra.mxu0 %v747_v0  ;;  %v761_v26 = vld [vmem:[#allocation8 + $0x128] sm:$0xff]  ;;  %v814_v0 = vld [vmem:[#allocation8 + $0x2d0] sm:$0xff] }
  0xf2   : > { %878 = vmatpush.msra.mxu3 %v729_v62  ;;  %921 = vmatpush.msra.mxu1 %v764_v1  ;;  %v832_v62 = vld [vmem:[#allocation8 + $0x360] sm:$0xff]  ;;  %v831_v1 = vld [vmem:[#allocation8 + $0x358] sm:$0xff] }
  0xf3   : > { %1440 = vmatmul.msk.f32.gmra.mxu1 %vm438_vm1, %v662_v27  ;;  %900 = vmatpush.msra.mxu0 %v746_v5  ;;  %v775_v27 = vld [vmem:[#allocation8 + $0x198] sm:$0xff]  ;;  %v844_v5 = vld [vmem:[#allocation8 + $0x3c0] sm:$0xff] }
  0xf4   : > { %879 = vmatpush.msra.mxu3 %v728_v2  ;;  %922 = vmatpush.msra.mxu1 %v763_v8  ;;  %v845_v2 = vld [vmem:[#allocation8 + $0x3c8] sm:$0xff]  ;;  %v843_v8 = vld [vmem:[#allocation8 + $0x3b8] sm:$0xff] }
  0xf5   : > { %1436 = vmatmul.msk.f32.gmra.mxu3 %vm438_vm1, %v598_v30  ;;  %901 = vmatpush.msra.mxu0 %v745_v9  ;;  %v760_v30 = vld [vmem:[#allocation8 + $0x120] sm:$0xff]  ;;  %v811_v9 = vld [vmem:[#allocation8 + $0x2b8] sm:$0xff] }
  0xf6   : > { %880 = vmatpush.msra.mxu3 %v727_v6  ;;  %923 = vmatpush.msra.mxu1 %v762_v12  ;;  %v812_v6 = vld [vmem:[#allocation8 + $0x2c0] sm:$0xff]  ;;  %v810_v12 = vld [vmem:[#allocation8 + $0x2b0] sm:$0xff] }
  0xf7   : > { %902 = vmatpush.msra.mxu0 %v744_v25  ;;  %v865_v25 = vld [vmem:[#allocation8 + $0x468] sm:$0xff] }
  0xf8   : > { %881 = vmatpush.msra.mxu3 %v726_v10  ;;  %924 = vmatpush.msra.mxu1 %v761_v26  ;;  %v828_v10 = vld [vmem:[#allocation8 + $0x340] sm:$0xff]  ;;  %v807_v26 = vld [vmem:[#allocation8 + $0x298] sm:$0xff] }
  0xf9   : > { %1433 = vmatmul.msk.f32.vlgmr.msra.gmra.mxu2 %vm438_vm1, %v565_v34  ;;  %903 = vmatpush.msra.mxu0 %v743_v29  ;;  %v759_v34 = vld [vmem:[#allocation8 + $0x118] sm:$0xff]  ;;  %v824_v29 = vld [vmem:[#allocation8 + $0x320] sm:$0xff] }
  0xfa   : > { %937 = vmatpush.msra.mxu2 %v787_v38  ;;  %882 = vmatpush.msra.mxu3 %v725_v13  ;;  %v758_v38 = vld [vmem:[#allocation8 + $0x110] sm:$0xff] }
  0xfb   : > { %925 = vmatpush.msra.mxu1 %v760_v30  ;;  %904 = vmatpush.msra.mxu0 %v742_v33  ;;  %v838_v30 = vld [vmem:[#allocation8 + $0x390] sm:$0xff]  ;;  %v823_v33 = vld [vmem:[#allocation8 + $0x318] sm:$0xff] }
  0xfc   : > { %938 = vmatpush.msra.mxu2 %v786_v42  ;;  %883 = vmatpush.msra.mxu3 %v724_v15  ;;  %v740_v42 = vld [vmem:[#allocation8 + $0x80] sm:$0xff]  ;;  %v841_v15 = vld [vmem:[#allocation8 + $0x3a8] sm:$0xff] }
  0xfd   : > { %926 = vmatpush.msra.mxu1 %v759_v34  ;;  %905 = vmatpush.msra.mxu0 %v741_v37  ;;  %v863_v34 = vld [vmem:[#allocation8 + $0x458] sm:$0xff]  ;;  %v805_v37 = vld [vmem:[#allocation8 + $0x288] sm:$0xff] }
  0xfe   : > { %939 = vmatpush.msra.mxu2 %v785_v47  ;;  %960 = vmatpush.msrb.mxu3 %v803_v18  ;;  %v756_v47 = vld [vmem:[#allocation8 + $0x100] sm:$0xff]  ;;  %v867_v18 = vld [vmem:[#allocation8 + $0x478] sm:$0xff] }
  0xff   : > { %927 = vmatpush.msra.mxu1 %v758_v38  ;;  %906 = vmatpush.msra.mxu0 %v740_v42  ;;  %v822_v38 = vld [vmem:[#allocation8 + $0x310] sm:$0xff]  ;;  %v804_v42 = vld [vmem:[#allocation8 + $0x280] sm:$0xff] }
 0x100   : > { %940 = vmatpush.msra.mxu2 %v784_v51  ;;  %961 = vmatpush.msrb.mxu3 %v802_v19  ;;  %v849_v51 = vld [vmem:[#allocation8 + $0x3e8] sm:$0xff]  ;;  %v840_v19 = vld [vmem:[#allocation8 + $0x3a0] sm:$0xff] }
 0x101   : > { %1434 = vmatmul.msk.f32.gmra.mxu2 %vm438_vm1, %v566_v52  ;;  %928 = vmatpush.msra.mxu1 %v757_v43  ;;  %v790_v52 = vld [vmem:[#allocation8 + $0x210] sm:$0xff] }
 0x102   : > { %941 = vmatpush.msra.mxu2 %v783_v55  ;;  %962 = vmatpush.msrb.mxu3 %v801_v20  ;;  %v848_v55 = vld [vmem:[#allocation8 + $0x3e0] sm:$0xff] }
 0x103   : > { %983 = vmatpush.msrb.mxu0 %v819_v45  ;;  %929 = vmatpush.msra.mxu1 %v756_v47  ;;  %v821_v45 = vld [vmem:[#allocation8 + $0x308] sm:$0xff]  ;;  %v820_v47 = vld [vmem:[#allocation8 + $0x300] sm:$0xff] }
 0x104   : > { %942 = vmatpush.msra.mxu2 %v782_v59  ;;  %963 = vmatpush.msrb.mxu3 %v800_v21  ;;  %v847_v59 = vld [vmem:[#allocation8 + $0x3d8] sm:$0xff]  ;;  %v808_v21 = vld [vmem:[#allocation8 + $0x2a0] sm:$0xff] }
 0x105   : > { %984 = vmatpush.msrb.mxu0 %v818_v49  ;;  %1006 = vmatpush.msrb.mxu1 %v835_v50 }
 0x106   : > { %943 = vmatpush.msra.mxu2 %v781_v63  ;;  %964 = vmatpush.msrb.mxu3 %v799_v22  ;;  %v846_v63 = vld [vmem:[#allocation8 + $0x3d0] sm:$0xff]  ;;  %v825_v22 = vld [vmem:[#allocation8 + $0x328] sm:$0xff] }
 0x107   : > { %985 = vmatpush.msrb.mxu0 %v817_v53  ;;  %1007 = vmatpush.msrb.mxu1 %v834_v54  ;;  %v856_v54 = vld [vmem:[#allocation8 + $0x420] sm:$0xff] }
 0x108   : > { %944 = vmatpush.msra.mxu2 %v780_v3  ;;  %965 = vmatpush.msrb.mxu3 %v798_v23  ;;  %v813_v3 = vld [vmem:[#allocation8 + $0x2c8] sm:$0xff]  ;;  %v866_v23 = vld [vmem:[#allocation8 + $0x470] sm:$0xff] }
 0x109   : > { %1441 = vmatmul.msk.f32.vlgmr.msrb.gmra.mxu2 %vm438_vm1, %v693_v4  ;;  %986 = vmatpush.msrb.mxu0 %v816_v57  ;;  %v830_v4 = vld [vmem:[#allocation8 + $0x350] sm:$0xff] }
 0x10a   : > { %945 = vmatpush.msra.mxu2 %v779_v7  ;;  %966 = vmatpush.msrb.mxu3 %v797_v24  ;;  %v829_v7 = vld [vmem:[#allocation8 + $0x348] sm:$0xff]  ;;  %v839_v24 = vld [vmem:[#allocation8 + $0x398] sm:$0xff]  ;;  %v854_v57 = vld [vmem:[#allocation8 + $0x410] sm:$0xff] }
 0x10b   : > { %1008 = vmatpush.msrb.mxu1 %v833_v58  ;;  %987 = vmatpush.msrb.mxu0 %v815_v61  ;;  %v852_v61 = vld [vmem:[#allocation8 + $0x400] sm:$0xff] }
 0x10c   : > { %946 = vmatpush.msra.mxu2 %v778_v11  ;;  %967 = vmatpush.msrb.mxu3 %v796_v28  ;;  %v842_v11 = vld [vmem:[#allocation8 + $0x3b0] sm:$0xff] }
 0x10d   : > { %1009 = vmatpush.msrb.mxu1 %v832_v62  ;;  %988 = vmatpush.msrb.mxu0 %v814_v0 }
 0x10e   : > { %947 = vmatpush.msra.mxu2 %v777_v14  ;;  %968 = vmatpush.msrb.mxu3 %v795_v32  ;;  %v827_v14 = vld [vmem:[#allocation8 + $0x338] sm:$0xff]  ;;  %v806_v32 = vld [vmem:[#allocation8 + $0x290] sm:$0xff] }
 0x10f   : > { %1010 = vmatpush.msrb.mxu1 %v831_v1  ;;  %989 = vmatpush.msrb.mxu0 %v813_v3  ;;  %v1090_v3 = vld [vmem:[#allocation10 + $0x78] sm:$0xff] }
 0x110   : > { %948 = vmatpush.msra.mxu2 %v776_v16  ;;  %969 = vmatpush.msrb.mxu3 %v794_v36  ;;  %v809_v16 = vld [vmem:[#allocation8 + $0x2a8] sm:$0xff] }
 0x111   : > { %1442 = vmatmul.msk.f32.gmra.mxu2 %vm438_vm1, %v694_v17  ;;  %1011 = vmatpush.msrb.mxu1 %v830_v4  ;;  %v826_v17 = vld [vmem:[#allocation8 + $0x330] sm:$0xff] }
 0x112   : > { %949 = vmatpush.msra.mxu2 %v775_v27  ;;  %970 = vmatpush.msrb.mxu3 %v793_v40  ;;  %v836_v40 = vld [vmem:[#allocation8 + $0x380] sm:$0xff]  ;;  %v1089_v4 = vld [vmem:[#allocation10 + $0x70] sm:$0xff] }
 0x113   : > { %990 = vmatpush.msrb.mxu0 %v812_v6  ;;  %1012 = vmatpush.msrb.mxu1 %v829_v7  ;;  %v1087_v6 = vld [vmem:[#allocation10 + $0x60] sm:$0xff]  ;;  %v1086_v7 = vld [vmem:[#allocation10 + $0x58] sm:$0xff] }
 0x114   : > { %950 = vmatpush.msra.mxu2 %v774_v31  ;;  %971 = vmatpush.msrb.mxu3 %v792_v44  ;;  %v864_v31 = vld [vmem:[#allocation8 + $0x460] sm:$0xff] }
 0x115   : > { %991 = vmatpush.msrb.mxu0 %v811_v9  ;;  %1013 = vmatpush.msrb.mxu1 %v828_v10  ;;  %v1084_v9 = vld [vmem:[#allocation10 + $0x48] sm:$0xff]  ;;  %v1083_v10 = vld [vmem:[#allocation10 + $0x40] sm:$0xff] }
 0x116   : > { %951 = vmatpush.msra.mxu2 %v773_v35  ;;  %972 = vmatpush.msrb.mxu3 %v791_v48  ;;  %v837_v35 = vld [vmem:[#allocation8 + $0x388] sm:$0xff]  ;;  %v859_v48 = vld [vmem:[#allocation8 + $0x438] sm:$0xff] }
 0x117   : > { %992 = vmatpush.msrb.mxu0 %v810_v12  ;;  %1014 = vmatpush.msrb.mxu1 %v827_v14  ;;  %v1081_v12 = vld [vmem:[#allocation10 + $0x30] sm:$0xff]  ;;  %v1079_v14 = vld [vmem:[#allocation10 + $0x20] sm:$0xff] }
 0x118   : > { %952 = vmatpush.msra.mxu2 %v772_v39  ;;  %973 = vmatpush.msrb.mxu3 %v790_v52  ;;  %v862_v39 = vld [vmem:[#allocation8 + $0x450] sm:$0xff]  ;;  %v857_v52 = vld [vmem:[#allocation8 + $0x428] sm:$0xff] }
 0x119   : > { %993 = vmatpush.msrb.mxu0 %v809_v16  ;;  %1015 = vmatpush.msrb.mxu1 %v826_v17  ;;  %v1077_v17 = vld [vmem:[#allocation10 + $0x10] sm:$0xff] }
 0x11a   : > { %1029 = vmatpush.msrb.mxu2 %v851_v41  ;;  %974 = vmatpush.msrb.mxu3 %v789_v56  ;;  %v861_v41 = vld [vmem:[#allocation8 + $0x448] sm:$0xff] }
 0x11b   : > { %994 = vmatpush.msrb.mxu0 %v808_v21  ;;  %1016 = vmatpush.msrb.mxu1 %v825_v22 }
 0x11c   : > { %1030 = vmatpush.msrb.mxu2 %v850_v46  ;;  %975 = vmatpush.msrb.mxu3 %v788_v60  ;;  %v860_v46 = vld [vmem:[#allocation8 + $0x440] sm:$0xff] }
 0x11d   : > { %995 = vmatpush.msrb.mxu0 %v807_v26  ;;  %1017 = vmatpush.msrb.mxu1 %v824_v29 }
 0x11e   : > { %1031 = vmatpush.msrb.mxu2 %v849_v51  ;;  %v858_v51 = vld [vmem:[#allocation8 + $0x430] sm:$0xff] }
 0x11f   : > { %996 = vmatpush.msrb.mxu0 %v806_v32  ;;  %1018 = vmatpush.msrb.mxu1 %v823_v33 }
 0x120   : > { %1032 = vmatpush.msrb.mxu2 %v848_v55  ;;  %v855_v55 = vld [vmem:[#allocation8 + $0x418] sm:$0xff] }
 0x121   : > { %997 = vmatpush.msrb.mxu0 %v805_v37  ;;  %1019 = vmatpush.msrb.mxu1 %v822_v38 }
 0x122   : > { %1033 = vmatpush.msrb.mxu2 %v847_v59  ;;  %v853_v59 = vld [vmem:[#allocation8 + $0x408] sm:$0xff] }
 0x123   : > { %998 = vmatpush.msrb.mxu0 %v804_v42  ;;  %1020 = vmatpush.msrb.mxu1 %v821_v45 }
 0x124   : > { %1034 = vmatpush.msrb.mxu2 %v846_v63 }
 0x125   : > { %1021 = vmatpush.msrb.mxu1 %v820_v47 }
 0x126   : > { %1035 = vmatpush.msrb.mxu2 %v845_v2 }
 0x128   : > { %1036 = vmatpush.msrb.mxu2 %v844_v5  ;;  %v1088_v5 = vld [vmem:[#allocation10 + $0x68] sm:$0xff] }
 0x12a   : > { %1037 = vmatpush.msrb.mxu2 %v843_v8  ;;  %v1085_v8 = vld [vmem:[#allocation10 + $0x50] sm:$0xff] }
 0x12c   : > { %1038 = vmatpush.msrb.mxu2 %v842_v11  ;;  %v1082_v11 = vld [vmem:[#allocation10 + $0x38] sm:$0xff] }
 0x12e   : > { %1039 = vmatpush.msrb.mxu2 %v841_v15  ;;  %v1078_v15 = vld [vmem:[#allocation10 + $0x18] sm:$0xff] }
 0x130   : > { %1040 = vmatpush.msrb.mxu2 %v840_v19  ;;  %v1076_v19 = vld [vmem:[#allocation10 + $0x8] sm:$0xff] }
 0x132   : > { %1041 = vmatpush.msrb.mxu2 %v839_v24 }
 0x134   : > { %1042 = vmatpush.msrb.mxu2 %v838_v30 }
 0x136   : > { %1043 = vmatpush.msrb.mxu2 %v837_v35 }
 0x138   : > { %1044 = vmatpush.msrb.mxu2 %v836_v40 }
 0x158   : > { %v558_v13 = vpop.f32.mrf.mxu1 }
 0x159   : > { %953 = vmatmul.f32.vlgmr.msra.gmra.mxu2 %v558_v13  ;;  %v1080_v13 = vld [vmem:[#allocation10 + $0x28] sm:$0xff] }
 0x15a   : > { %v654_v50 = vpop.f32.mrf.mxu0 }
 0x15c   : > { %v462_v20 = vpop.f32.mrf.mxu2 }
 0x15d   : > { %884 = vmatmul.f32.vlgmr.msra.gmra.mxu3 %v462_v20  ;;  %v1075_v20 = vld [vmem:[#allocation10] sm:$0xff] }
 0x15e   : > { %1052 = vmatpush.msra.mxu3 %v867_v18 }
 0x160   : > { %v526_v27 = vpop.f32.mrf.mxu3  ;;  %1053 = vmatpush.msra.mxu3 %v866_v23  ;;  %v561_v28 = vpop.f32.mrf.mxu1 }
 0x161   : > { %930 = vmatmul.f32.vlgmr.msra.gmra.mxu1 %v526_v27  ;;  %956 = vmatmul.f32.gmra.mxu2 %v561_v28 }
 0x162   : > { %1054 = vmatpush.msra.mxu3 %v865_v25  ;;  %v657_v58 = vpop.f32.mrf.mxu0  ;;  %1118 = vmatpush.msra.mxu1 %v1090_v3 }
 0x164   : > { %v465_v36 = vpop.f32.mrf.mxu2  ;;  %1055 = vmatpush.msra.mxu3 %v864_v31  ;;  %1119 = vmatpush.msra.mxu1 %v1089_v4 }
 0x165   : > { %887 = vmatmul.f32.gmra.mxu3 %v465_v36 }
 0x166   : > { %1056 = vmatpush.msra.mxu3 %v863_v34  ;;  %1120 = vmatpush.msra.mxu1 %v1088_v5 }
 0x168   : > { %v529_v43 = vpop.f32.mrf.mxu3  ;;  %1057 = vmatpush.msra.mxu3 %v862_v39  ;;  %v686_v44 = vpop.f32.mrf.mxu1  ;;  %1121 = vmatpush.msra.mxu1 %v1087_v6 }
 0x169   : > { %933 = vmatmul.f32.gmra.mxu1 %v529_v43  ;;  %1045 = vmatmul.f32.vlgmr.msrb.gmra.mxu2 %v686_v44 }
 0x16a   : > { %1058 = vmatpush.msra.mxu3 %v861_v41  ;;  %1122 = vmatpush.msra.mxu1 %v1086_v7 }
 0x16c   : > { %v494_v49 = vpop.f32.mrf.mxu2  ;;  %1059 = vmatpush.msra.mxu3 %v860_v46  ;;  %1123 = vmatpush.msra.mxu1 %v1085_v8 }
 0x16d   : > { %907 = vmatmul.f32.vlgmr.msra.gmra.mxu0 %v494_v49 }
 0x16e   : > { %1060 = vmatpush.msra.mxu3 %v859_v48  ;;  %1091 = vmatpush.msra.mxu0 %v1090_v3 }
 0x16f   : > { %1124 = vmatpush.msra.mxu1 %v1084_v9 }
 0x170   : > { %1061 = vmatpush.msra.mxu3 %v858_v51  ;;  %v689_v53 = vpop.f32.mrf.mxu1  ;;  %v622_v60 = vpop.f32.mrf.mxu3  ;;  %1092 = vmatpush.msra.mxu0 %v1089_v4 }
 0x171   : > { %1022 = vmatmul.f32.vlgmr.msrb.gmra.mxu1 %v654_v50  ;;  %1048 = vmatmul.f32.gmra.mxu2 %v689_v53 }
 0x172   : > { %1062 = vmatpush.msra.mxu3 %v857_v52  ;;  %1093 = vmatpush.msra.mxu0 %v1088_v5 }
 0x173   : > { %1125 = vmatpush.msra.mxu1 %v1083_v10 }
 0x174   : > { %v497_v56 = vpop.f32.mrf.mxu2  ;;  %1063 = vmatpush.msra.mxu3 %v856_v54  ;;  %1094 = vmatpush.msra.mxu0 %v1087_v6 }
 0x175   : > { %910 = vmatmul.f32.gmra.mxu0 %v497_v56  ;;  %1126 = vmatpush.msra.mxu1 %v1082_v11 }
 0x176   : > { %1064 = vmatpush.msra.mxu3 %v855_v55  ;;  %1095 = vmatpush.msra.mxu0 %v1086_v7 }
 0x177   : > { %1127 = vmatpush.msra.mxu1 %v1081_v12 }
 0x178   : > { %1065 = vmatpush.msra.mxu3 %v854_v57  ;;  %v625_v63 = vpop.f32.mrf.mxu3  ;;  %1096 = vmatpush.msra.mxu0 %v1085_v8 }
 0x179   : > { %1025 = vmatmul.f32.gmra.mxu1 %v657_v58 }
 0x17a   : > { %1066 = vmatpush.msra.mxu3 %v853_v59  ;;  %1097 = vmatpush.msra.mxu0 %v1084_v9 }
 0x17b   : > { %1128 = vmatpush.msra.mxu1 %v1080_v13 }
 0x17c   : > { %v590_v62 = vpop.f32.mrf.mxu2  ;;  %1067 = vmatpush.msra.mxu3 %v852_v61  ;;  %1098 = vmatpush.msra.mxu0 %v1083_v10 }
 0x17d   : > { %976 = vmatmul.f32.vlgmr.msrb.gmra.mxu3 %v590_v62  ;;  %999 = vmatmul.f32.vlgmr.msrb.gmra.mxu0 %v622_v60 }
 0x17e   : > { %1099 = vmatpush.msra.mxu0 %v1082_v11  ;;  %1129 = vmatpush.msra.mxu1 %v1079_v14 }
 0x180   : > { %1100 = vmatpush.msra.mxu0 %v1081_v12  ;;  %1130 = vmatpush.msra.mxu1 %v1078_v15 }
 0x182   : > { %1101 = vmatpush.msra.mxu0 %v1080_v13  ;;  %1131 = vmatpush.msra.mxu1 %v1077_v17 }
 0x184   : > { %v593_v0 = vpop.f32.mrf.mxu2  ;;  %1102 = vmatpush.msra.mxu0 %v1079_v14  ;;  %1132 = vmatpush.msra.mxu1 %v1076_v19 }
 0x185   : > { %979 = vmatmul.f32.gmra.mxu3 %v593_v0  ;;  %1002 = vmatmul.f32.gmra.mxu0 %v625_v63 }
 0x186   : > { %1103 = vmatpush.msra.mxu0 %v1078_v15  ;;  %1133 = vmatpush.msra.mxu1 %v1075_v20 }
 0x188   : > { %1104 = vmatpush.msra.mxu0 %v1077_v17 }
 0x18a   : > { %1105 = vmatpush.msra.mxu0 %v1076_v19 }
 0x18c   : > { %v718_v1 = vpop.f32.mrf.mxu2  ;;  %1106 = vmatpush.msra.mxu0 %v1075_v20 }
 0x18d   : > { %1068 = vmatmul.f32.vlgmr.msra.gmra.mxu3 %v718_v1 }
 0x194   : > { %v721_v2 = vpop.f32.mrf.mxu2 }
 0x195   : > { %1071 = vmatmul.f32.gmra.mxu3 %v721_v2 }
 0x1dc   : > { %v954_v23 = vpop.f32.mrf.mxu2 }
 0x1de   : > { %v931_v21 = vpop.f32.mrf.mxu1 }
 0x1e0   : > { %v885_v16 = vpop.f32.mrf.mxu3 }
 0x1e4   : > { %v957_v31 = vpop.f32.mrf.mxu2 }
 0x1e6   : > { %v934_v27 = vpop.f32.mrf.mxu1 }
 0x1e8   : > { %v888_v22 = vpop.f32.mrf.mxu3 }
 0x1ea   : > { %v908_v18 = vpop.f32.mrf.mxu0 }
 0x1eb   : > { %v909_v24 = vadd.f32 %v908_v18, %v885_v16 }
 0x1ec   : > { %v1046_v39 = vpop.f32.mrf.mxu2 }
 0x1ed   : > { %v932_v26 = vadd.f32 %v931_v21, %v909_v24 }
 0x1ee   : > { %v1023_v35 = vpop.f32.mrf.mxu1 }
 0x1ef   : > { %v955_v29 = vadd.f32 %v954_v23, %v932_v26  ;;  %v1544_v23 = vld [vmem:[%s2070_s6] ss:$0 sm:$0xff] }
 0x1f2   : > { %v911_v25 = vpop.f32.mrf.mxu0 }
 0x1f3   : > { %v912_v30 = vadd.f32 %v911_v25, %v888_v22  ;;  %v1545_v25 = vld [vmem:[%s2071_s7] ss:$0 sm:$0xff] }
 0x1f4   : > { %v1049_v49 = vpop.f32.mrf.mxu2 }
 0x1f5   : > { %v935_v34 = vadd.f32 %v934_v27, %v912_v30 }
 0x1f6   : > { %v1026_v45 = vpop.f32.mrf.mxu1 }
 0x1f7   : > { %v958_v38 = vadd.f32 %v957_v31, %v935_v34 }
 0x1fa   : > { %v1000_v32 = vpop.f32.mrf.mxu0 }
 0x200   : > { %v977_v28 = vpop.f32.mrf.mxu3 }
 0x201   : > { %v978_v33 = vadd.f32 %v977_v28, %v955_v29 }
 0x202   : > { %v1003_v42 = vpop.f32.mrf.mxu0 }
 0x203   : > { %v1001_v36 = vadd.f32 %v1000_v32, %v978_v33 }
 0x205   : > { %v1024_v40 = vadd.f32 %v1023_v35, %v1001_v36 }
 0x207   : > { %v1047_v43 = vadd.f32 %v1046_v39, %v1024_v40 }
 0x208   : > { %v980_v37 = vpop.f32.mrf.mxu3 }
 0x209   : > { %v981_v41 = vadd.f32 %v980_v37, %v958_v38 }
 0x20b   : > { %v1004_v44 = vadd.f32 %v1003_v42, %v981_v41 }
 0x20d   : > { %v1027_v48 = vadd.f32 %v1026_v45, %v1004_v44 }
 0x20f   : > { %v1050_v50 = vadd.f32 %v1049_v49, %v1027_v48 }
 0x210   : > { %v1069_v46 = vpop.f32.mrf.mxu3 }
 0x211   : > { %v1070_v47 = vadd.f32 %v1069_v46, %v1047_v43 }
 0x213   : > { %1107 = vmatmul.f32.vlgmr.msra.gmra.mxu0 %v1070_v47 }
 0x218   : > { %v1072_v51 = vpop.f32.mrf.mxu3 }
 0x219   : > { %v1073_v52 = vadd.f32 %v1072_v51, %v1050_v50 }
 0x21b   : > { %1110 = vmatmul.f32.gmra.mxu0 %v1073_v52 }
 0x290   : > { %v1108_v53 = vpop.f32.mrf.mxu0 }
 0x291   : > { %v1114_v54 = vsub.f32 %v1070_v47, %v1108_v53 }
 0x293   : > { %v1116_v55 = vmul.f32 %v1114_v54, %v1114_v54 }
 0x295   : > { %1134 = vmatmul.f32.vlgmr.msra.gmra.mxu1 %v1116_v55 }
 0x298   : > { %v1111_v56 = vpop.f32.mrf.mxu0 }
 0x299   : > { %v1115_v57 = vsub.f32 %v1073_v52, %v1111_v56 }
 0x29b   : > { %v1117_v58 = vmul.f32 %v1115_v57, %v1115_v57 }
 0x29d   : > { %1137 = vmatmul.f32.gmra.mxu1 %v1117_v58 }
 0x312   : > { %v1135_v59 = vpop.f32.mrf.mxu1 }
 0x313   : > { %1546 = vrsqrt.f32 %v1135_v59  ;;  %vm1148_vm2 = vcmp.eq.f32.partialorder %v1135_v59, inf  ;;  %v1151_v7 = vand.u32 2147483648, %v1135_v59  ;;  %vm1150_vm3 = vcmp.eq.f32.partialorder %v1135_v59, 0.0 }
 0x319   : > { %v1547_v60 = vpop.eup %1546 }
 0x31a   : > { %v1142_v61 = vmul.f32 %v1547_v60, %v1135_v59  ;;  %v1138_v62 = vpop.f32.mrf.mxu1 }
 0x31b   : > { %1548 = vrsqrt.f32 %v1138_v62  ;;  %vm1160_vm4 = vcmp.eq.f32.partialorder %v1138_v62, inf  ;;  %v1163_v15 = vand.u32 2147483648, %v1138_v62  ;;  %vm1162_vm5 = vcmp.eq.f32.partialorder %v1138_v62, 0.0 }
 0x31c   : > { %v1143_v63 = vmul.f32 %v1547_v60, %v1142_v61 }
 0x31e   : > { %v1144_v0 = vmul.f32 0.5, %v1143_v63 }
 0x320   : > { %v1145_v1 = vsub.f32 1.5, %v1144_v0 }
 0x321   : > { %v1549_v2 = vpop.eup %1548 }
 0x322   : > { %v1146_v3 = vmul.f32 %v1547_v60, %v1145_v1  ;;  %v1154_v4 = vmul.f32 %v1549_v2, %v1138_v62 }
 0x324   : > { %v1147_v5 = vmul.f32 %v1146_v3, %v1135_v59  ;;  %v1155_v6 = vmul.f32 %v1549_v2, %v1154_v4 }
 0x326   : > { %v1149_v8 = vsel %vm1148_vm2, %v1135_v59, %v1147_v5  ;;  %v1156_v9 = vmul.f32 0.5, %v1155_v6 }
 0x327   : > { %v1152_v10 = vsel %vm1150_vm3, %v1151_v7, %v1149_v8 }
 0x328   : > { %v1165_v11 = vadd.f32 1e-05, %v1152_v10  ;;  %v1157_v12 = vsub.f32 1.5, %v1156_v9 }
 0x32a   : > { %1550 = vrcp.f32 %v1165_v11  ;;  %v1158_v13 = vmul.f32 %v1549_v2, %v1157_v12 }
 0x32c   : > { %v1159_v14 = vmul.f32 %v1158_v13, %v1138_v62 }
 0x32e   : > { %v1161_v16 = vsel %vm1160_vm4, %v1138_v62, %v1159_v14 }
 0x32f   : > { %v1164_v17 = vsel %vm1162_vm5, %v1163_v15, %v1161_v16 }
 0x330   : > { %v1551_v18 = vpop.eup %1550  ;;  %v1166_v19 = vadd.f32 1e-05, %v1164_v17 }
 0x331   : > { %v1169_v20 = vmul.f32 %v1551_v18, %v1165_v11 }
 0x332   : > { %1552 = vrcp.f32 %v1166_v19 }
 0x333   : > { %v1171_v21 = vsub.f32 2.0, %v1169_v20 }
 0x335   : > { %v1173_v22 = vmul.f32 %v1551_v18, %v1171_v21 }
 0x337   : > { %v1175_v24 = vmul.f32 %v1173_v22, %v1114_v54 }
 0x338   : > { %v1553_v26 = vpop.eup %1552 }
 0x339   : > { %v1170_v27 = vmul.f32 %v1553_v26, %v1166_v19  ;;  %v1181_v28 = vmul.f32 %v1544_v23, %v1175_v24 }
 0x33b   : > { %v1172_v29 = vsub.f32 2.0, %v1170_v27  ;;  %v2011_v30 = vadd.f32 %v1545_v25, %v1181_v28 }
 0x33d   : > { %v1174_v31 = vmul.f32 %v1553_v26, %v1172_v29  ;;  %v2014_v32 = vmul.f32 0.70710677, %v2011_v30 }
 0x33f   : > { %v1176_v33 = vmul.f32 %v1174_v31, %v1115_v57  ;;  %v1193_v34 = vmul.f32 %v2014_v32, %v2014_v32 }
 0x341   : > { %v1182_v35 = vmul.f32 %v1544_v23, %v1176_v33  ;;  %v1194_v36 = vmin.f32 %v1193_v34, 16.0 }
 0x343   : > { %v2018_v37 = vadd.f32 %v1545_v25, %v1182_v35  ;;  %v1195_v38 = vmul.f32 2.1237322e-06, %v1194_v36  ;;  %v1206_v39 = vmul.f32 3.8918573e-05, %v1194_v36 }
 0x345   : > { %v2021_v40 = vmul.f32 0.70710677, %v2018_v37  ;;  %v1196_v41 = vadd.f32 0.00028619796, %v1195_v38  ;;  %v1207_v42 = vadd.f32 0.001143296, %v1206_v39 }
 0x347   : > { %v1197_v43 = vmul.f32 %v1196_v41, %v1194_v36  ;;  %v1233_v44 = vmul.f32 %v2021_v40, %v2021_v40  ;;  %v1208_v45 = vmul.f32 %v1207_v42, %v1194_v36  ;;  %v1189_v41 = vmul.f32 0.5, %v2011_v30 }
 0x349   : > { %v1234_v46 = vmin.f32 %v1233_v44, 16.0  ;;  %v1209_v47 = vadd.f32 0.014752088, %v1208_v45  ;;  %v1198_v48 = vadd.f32 0.0036580483, %v1197_v43 }
 0x34b   : > { %v1235_v49 = vmul.f32 2.1237322e-06, %v1234_v46  ;;  %v1246_v50 = vmul.f32 3.8918573e-05, %v1234_v46  ;;  %v1210_v51 = vmul.f32 %v1209_v47, %v1194_v36  ;;  %v1199_v55 = vmul.f32 %v1198_v48, %v1194_v36 }
 0x34c   : > { %v1190_v48 = vmul.f32 0.5, %v2018_v37 }
 0x34d   : > { %v1236_v52 = vadd.f32 0.00028619796, %v1235_v49  ;;  %v1247_v53 = vadd.f32 0.001143296, %v1246_v50  ;;  %v1211_v54 = vadd.f32 0.112945676, %v1210_v51 }
 0x34e   : > { %v1200_v62 = vadd.f32 0.05243302, %v1199_v55 }
 0x34f   : > { %v1237_v56 = vmul.f32 %v1236_v52, %v1234_v46  ;;  %v1248_v57 = vmul.f32 %v1247_v53, %v1234_v46  ;;  %v1212_v58 = vmul.f32 %v1211_v54, %v1194_v36 }
 0x350   : > { %v1201_v4 = vmul.f32 %v1200_v62, %v1194_v36 }
 0x351   : > { %v1249_v59 = vadd.f32 0.014752088, %v1248_v57  ;;  %v1213_v60 = vadd.f32 0.4994258, %v1212_v58  ;;  %v1238_v61 = vadd.f32 0.0036580483, %v1237_v56 }
 0x352   : > { %v1202_v8 = vadd.f32 0.18741608, %v1201_v4 }
 0x353   : > { %v1250_v63 = vmul.f32 %v1249_v59, %v1234_v46  ;;  %v1214_v0 = vmul.f32 %v1213_v60, %v1194_v36  ;;  %v1239_v3 = vmul.f32 %v1238_v61, %v1234_v46 }
 0x354   : > { %v1203_v13 = vmul.f32 %v1202_v8, %v1194_v36 }
 0x355   : > { %v1251_v1 = vadd.f32 0.112945676, %v1250_v63  ;;  %v1215_v2 = vadd.f32 1.0, %v1214_v0  ;;  %v1240_v7 = vadd.f32 0.05243302, %v1239_v3 }
 0x356   : > { %v1204_v18 = vadd.f32 1.1283791, %v1203_v13 }
 0x357   : > { %v1252_v5 = vmul.f32 %v1251_v1, %v1234_v46  ;;  %1554 = vrcp.f32 %v1215_v2  ;;  %v1241_v12 = vmul.f32 %v1240_v7, %v1234_v46  ;;  %v1227_v16 = vand.u32 2147483648, %v1215_v2 }
 0x358   : > { %v1225_v20 = vand.u32 2147483647, %v1215_v2  ;;  %vm1221_vm7 = vweird.f32 %v1215_v2  ;;  %v1205_v26 = vmul.f32 %v1204_v18, %v2014_v32 }
 0x359   : > { %v1253_v6 = vadd.f32 0.4994258, %v1252_v5  ;;  %v1242_v17 = vadd.f32 0.18741608, %v1241_v12  ;;  %v1228_v23 = vor.u32 1.1754944e-38, %v1227_v16 }
 0x35a   : > { %vm1226_vm9 = vcmp.eq.f32.partialorder %v1225_v20, 8.507059e+37 }
 0x35b   : > { %v1254_v9 = vmul.f32 %v1253_v6, %v1234_v46  ;;  %v1243_v24 = vmul.f32 %v1242_v17, %v1234_v46 }
 0x35d   : > { %v1255_v10 = vadd.f32 1.0, %v1254_v9  ;;  %v1555_v11 = vpop.eup %1554  ;;  %v1244_v34 = vadd.f32 1.1283791, %v1243_v24 }
 0x35e   : > { %v1217_v14 = vmul.f32 %v1555_v11, %v1215_v2  ;;  %vm1222_vm6 = vweird.f32 %v1555_v11 }
 0x35f   : > { %1556 = vrcp.f32 %v1255_v10  ;;  %vm1223_vm8 = vmor %vm1221_vm7, %vm1222_vm6  ;;  %v1267_v33 = vand.u32 2147483648, %v1255_v10  ;;  %v1265_v36 = vand.u32 2147483647, %v1255_v10  ;;  %vm1261_vm11 = vweird.f32 %v1255_v10 }
 0x360   : > { %v1218_v15 = vsub.f32 1.0, %v1217_v14  ;;  %v1245_v43 = vmul.f32 %v1244_v34, %v2021_v40 }
 0x361   : > { %v1268_v42 = vor.u32 1.1754944e-38, %v1267_v33  ;;  %vm1266_vm13 = vcmp.eq.f32.partialorder %v1265_v36, 8.507059e+37 }
 0x362   : > { %v1219_v19 = vmul.f32 %v1555_v11, %v1218_v15 }
 0x364   : > { %v1220_v22 = vadd.f32 %v1555_v11, %v1219_v19 }
 0x365   : > { %v1557_v21 = vpop.eup %1556 }
 0x366   : > { %v1257_v25 = vmul.f32 %v1557_v21, %v1255_v10  ;;  %v1224_v27 = vsel %vm1223_vm8, %v1555_v11, %v1220_v22  ;;  %vm1262_vm10 = vweird.f32 %v1557_v21 }
 0x367   : > { %v1229_v28 = vsel %vm1226_vm9, %v1228_v23, %v1224_v27  ;;  %vm1263_vm12 = vmor %vm1261_vm11, %vm1262_vm10 }
 0x368   : > { %v1258_v29 = vsub.f32 1.0, %v1257_v25  ;;  %v1230_v31 = vmul.f32 %v1229_v28, %v1205_v26 }
 0x36a   : > { %v1259_v35 = vmul.f32 %v1557_v21, %v1258_v29  ;;  %v1443_v38 = vclamps-f32 %v1230_v31, 1.0 }
 0x36c   : > { %v1260_v39 = vadd.f32 %v1557_v21, %v1259_v35  ;;  %v1273_v32 = vadd.f32 1.0, %v1443_v38 }
 0x36e   : > { %v1264_v44 = vsel %vm1263_vm12, %v1557_v21, %v1260_v39  ;;  %v1275_v46 = vmul.f32 %v1273_v32, %v1189_v41 }
 0x36f   : > { %v1269_v45 = vsel %vm1266_vm13, %v1268_v42, %v1264_v44 }
 0x370   : > { %v1270_v47 = vmul.f32 %v1269_v45, %v1245_v43  ;;  %1277 = vst [vmem:[%s391_s22] sm:$0xff] %v1275_v46 }
 0x372   : > { %v1444_v30 = vclamps-f32 %v1270_v47, 1.0 }
 0x374   : > { %v1274_v40 = vadd.f32 1.0, %v1444_v30 }
 0x376   : > { %v1276_v49 = vmul.f32 %v1274_v40, %v1190_v48 }
 0x378   : > { %1278 = vst [vmem:[%s391_s22 + $0x8] sm:$0xff] %v1276_v49 }
 0x379   : > { %1735 = shalt.err (!%p1732_p10)
}
 0x37a   : > { %s1790_s18 = smov 128   ;;  %s1791_s20 = smov 8  }
 0x37b   : > { %1470 = dma.vmem_to_hbm [thread:$0]  (%p1933_p3), %s1293_s9, 256, %s1295_s3, %s1280_s17, %s1790_s18, %s1790_s18, %s1791_s20  }
 0x37c PF: > { %s1309_s21 = sand.u32 1, %s1770_s27   ;;  %p2087_p12 = scmp.ge.s32.totalorder %s1782_s30, 2 }
 0x37d   : > { %s1310_s25 = scalar_lea.sflag [#allocation4], %s1309_s21 }
 0x37e   : > { %p1490_p13 = pnand %p2087_p12, %p1872_p6 }
 0x380   : > { %p1491_p0 = pneg %p1490_p13 }
 0x382   : > { %1765 = dma.done.wait (%p1491_p0), %s1310_s25, 256  }
 0x383   : > { %1767 = vsyncadd (%p1491_p0), %s1310_s25, 4294967040  ;;  %p23_p5 = scmp.ge.s32.totalorder %s1923_s26, 4   ;;  %s2088_s27 = smov %s1774_s28 }
 0x384   : > { %s2089_s28 = smov %s1778_s29  ;;  %s2090_s29 = smov %s1939_s15 }
 0x385   : > { %s2091_s30 = smov %s1923_s26  ;;  %25 = sbr.rel (!%p23_p5) target bundleno = 10 (0xa), region = 121 }
 0x38a   :  { %1316 = vsyncpa [#allocation3], 1 }
 0x38b   :  { %1318 = vsyncpa [#allocation3 + $0x1], 1 }
 0x38c   :  { %1319 = vsyncpa [#allocation6], 1 }
 0x38d   :  { %1320 = vsyncpa [#allocation9], 1 }
 0x38e   :  { %1321 = vsyncpa [#allocation4], 1 }
 0x38f   :  { %1323 = vsyncpa [#allocation4 + $0x1], 1 }

</bundles_post_ra>
